<compile_context>
chip_gen: v7x
topology: tpu7x:2x2x1
jax: 0.10.0
libtpu: 0.0.40
codegen_flags: <defaults>
</compile_context>

<pallas_src>
import jax
import jax.numpy as jnp
import numpy as np
from jax import lax
from jax.experimental import pallas as pl
from jax.experimental.pallas import tpu as pltpu


def _round_up(n, m):
    return ((n + m - 1) // m) * m


# ----------------------------------------------------------------------------
# Pallas kernel: `rows` output rows of one batch element per grid step.
# ----------------------------------------------------------------------------
def _bottleneck_kernel(xt_ref, xm_ref, xb_ref, w1_ref, w2_ref, w3_ref, b_ref, o_ref):
    # xt/xb: (1, 1, W, Cp) bf16 halo rows; xm: (1, rows, W, Cp) bf16.
    rows, W, Cp = xm_ref.shape[1], xm_ref.shape[2], xm_ref.shape[3]
    Pp = w1_ref.shape[1]
    M = rows * W
    Mh = (rows + 2) * W

    r = pl.program_id(1)
    n_rb = pl.num_programs(1)

    # ---- conv1 (1x1, BN folded) on rows + 1-row halo : one MXU matmul -------
    xin = jnp.concatenate(
        [xt_ref[0, 0], xm_ref[0].reshape(M, Cp), xb_ref[0, 0]], axis=0)  # (Mh, Cp)
    a1 = jnp.dot(xin, w1_ref[...], preferred_element_type=jnp.float32)   # (Mh, Pp)
    a1 = jnp.maximum(a1 + b_ref[0:1, :Pp], 0.0)

    # conv2's spatial zero padding: the halo rows must be exactly zero at the
    # image top/bottom boundary (conv1 of a clamped row + bias is not zero).
    fidx = lax.broadcasted_iota(jnp.int32, (Mh, 1), 0)
    keep = jnp.logical_and(
        jnp.logical_or(r > 0, fidx >= W),
        jnp.logical_or(r < n_rb - 1, fidx < (rows + 1) * W))
    a1 = jnp.where(keep, a1, 0.0).astype(jnp.bfloat16)

    # dx = -1 / +1 shifted copies of a1 with zeros at the left/right image edge.
    xpos = fidx % W
    zrow = jnp.zeros((1, Pp), jnp.bfloat16)
    a1_l = jnp.where(xpos != 0, jnp.concatenate([zrow, a1[:-1]], axis=0), 0)
    a1_r = jnp.where(xpos != W - 1, jnp.concatenate([a1[1:], zrow], axis=0), 0)

    # ---- conv2 (3x3, pad=1) as 9 tap-accumulated MXU matmuls (no im2col) ----
    acc = None
    taps = (a1_l, a1, a1_r)                      # dx = 0, 1, 2  <->  x-1, x, x+1
    for dy in range(3):
        for dx in range(3):
            src = taps[dx][dy * W:dy * W + M]    # (M, Pp) bf16 slab
            w_lo = (dy * 3 + dx) * Pp
            part = jnp.dot(src, w2_ref[w_lo:w_lo + Pp, :],
                           preferred_element_type=jnp.float32)
            acc = part if acc is None else acc + part
    a2 = jnp.maximum(acc + b_ref[1:2, :Pp], 0.0).astype(jnp.bfloat16)    # (M, Pp)

    # ---- conv3 (1x1) + bias + residual + relu -------------------------------
    a3 = jnp.dot(a2, w3_ref[...], preferred_element_type=jnp.float32)    # (M, Cp)
    res = xm_ref[0].reshape(M, Cp).astype(jnp.float32)   # re-read ref: short live range
    y = jnp.maximum(a3 + b_ref[2:3, :Cp] + res, 0.0)
    o_ref[0] = y.reshape(rows, W, Cp).astype(o_ref.dtype)


# ----------------------------------------------------------------------------
# Wrappers
# ----------------------------------------------------------------------------
def _pick_rows(H):
    for r in (16, 8):
        if H % r == 0:
            return r
    return H


def _vmem_limit_bytes(rows, W, Cp, Pp, Cmax):
    Mh, M = (rows + 2) * W, rows * W
    acts = 2 * 2 * (Mh * Cp + M * Cp)                          # bf16 x/y blocks, 2x buffered
    wts = 2 * (2 * (Cp * Pp + 9 * Pp * Pp + Pp * Cp) + 4 * 3 * Cmax)
    tmps = 2 * (Mh * Cp + 3 * Mh * Pp) + 4 * (Mh * Pp + M * Pp + 2 * M * Cp)
    est = acts + wts + tmps
    return int(min(max(2 * est, 16 * 2 ** 20), 48 * 2 ** 20))


def bottleneck_pallas_nhwc(x_nhwc, params, rows=None):
    """Hot-path entry point.  x_nhwc: (B, H, W, Cin) f32 or bf16 -> (B, H, W, Cin) bf16.

    No layout transposes; the channel pad/slice is a no-op for real ResNet
    widths (Cin % 128 == 0)."""
    B, H, W, Cin = x_nhwc.shape
    w1p, w2p, w3p, bias = params['w1p'], params['w2p'], params['w3p'], params['bias']
    Cp, Pp = w1p.shape
    Cmax = bias.shape[1]

    if rows is None:
        rows = _pick_rows(H)
    assert H % rows == 0, "H must be divisible by the row-block size"
    assert W % 8 == 0, "W must be a multiple of 8 (sublane-aligned HW flatten)"
    n_rb = H // rows

    if Cp != Cin:                       # no-op for real ResNet widths
        x_nhwc = jnp.pad(x_nhwc, ((0, 0), (0, 0), (0, 0), (0, Cp - Cin)))
    x_bf = x_nhwc.astype(jnp.bfloat16)  # bf16 at the HBM boundary

    row_spec = pl.BlockSpec((1, rows, W, Cp), lambda b, r: (b, r, 0, 0))
    halo_top = pl.BlockSpec((1, 1, W, Cp),
                            lambda b, r: (b, jnp.maximum(r * rows - 1, 0), 0, 0))
    halo_bot = pl.BlockSpec((1, 1, W, Cp),
                            lambda b, r: (b, jnp.minimum(r * rows + rows, H - 1), 0, 0))

    def wspec(shape):
        return pl.BlockSpec(shape, lambda b, r: (0, 0))

    out = pl.pallas_call(
        _bottleneck_kernel,
        out_shape=jax.ShapeDtypeStruct((B, H, W, Cp), jnp.bfloat16),
        grid=(B, n_rb),
        in_specs=[
            halo_top, row_spec, halo_bot,          # x (same array, three views)
            wspec((Cp, Pp)),                       # w1 (BN folded)
            wspec((9 * Pp, Pp)),                   # w2 (3x3 taps stacked)
            wspec((Pp, Cp)),                       # w3 (BN folded)
            wspec((3, Cmax)),                      # packed biases
        ],
        out_specs=row_spec,
        compiler_params=pltpu.CompilerParams(
            dimension_semantics=("parallel", "parallel"),
            vmem_limit_bytes=_vmem_limit_bytes(rows, W, Cp, Pp, Cmax)),
    )(x_bf, x_bf, x_bf, w1p, w2p, w3p, bias)

    return out if Cp == Cin else out[..., :Cin]


def bottleneck_pallas(x_nchw, params, rows=None):
    """PyTorch-layout adapter (NCHW f32 in / f32 out).  Not the hot path: the
    transposes/casts each re-read and re-write the activations in HBM."""
    x = jnp.transpose(x_nchw, (0, 2, 3, 1))
    y = bottleneck_pallas_nhwc(x, params, rows=rows)
    return jnp.transpose(y.astype(x_nchw.dtype), (0, 3, 1, 2))


# ----------------------------------------------------------------------------
# Deterministic parameter construction (shapes from Bottleneck.__init__)
# ----------------------------------------------------------------------------
def make_params(key, inplanes, planes):
    expansion = 4
    cout = planes * expansion
    assert inplanes == cout, "downsample=None requires inplanes == planes*4"
    eps = 1e-5
    ks = jax.random.split(key, 15)

    def bn_stats(kg, kb, km, kv, c):
        gamma = 0.5 + jax.random.uniform(kg, (c,), jnp.float32)
        beta = 0.1 * jax.random.normal(kb, (c,), jnp.float32)
        mean = 0.1 * jax.random.normal(km, (c,), jnp.float32)
        var = 0.5 + jax.random.uniform(kv, (c,), jnp.float32)
        return gamma, beta, mean, var

    w1 = 0.1 * jax.random.normal(ks[0], (inplanes, planes), jnp.float32)
    w2_hwio = 0.1 * jax.random.normal(ks[1], (3, 3, planes, planes), jnp.float32)
    w3 = 0.1 * jax.random.normal(ks[2], (planes, cout), jnp.float32)

    bn1 = bn_stats(ks[3], ks[4], ks[5], ks[6], planes)
    bn2 = bn_stats(ks[7], ks[8], ks[9], ks[10], planes)
    bn3 = bn_stats(ks[11], ks[12], ks[13], ks[14], cout)

    def fold(g, b, m, v):
        s = g / jnp.sqrt(v + eps)
        return s, b - m * s

    s1, b1 = fold(*bn1)
    s2, b2 = fold(*bn2)
    s3, b3 = fold(*bn3)

    # fold BN scales into conv weights, pad channels to 128, cast bf16
    Ppad = _round_up(planes, 128)
    Cpad = _round_up(cout, 128)
    Cmax = max(Ppad, Cpad)

    w1f = w1 * s1[None, :]
    w2f = w2_hwio * s2[None, None, None, :]
    w3f = w3 * s3[None, :]

    w1p = (jnp.zeros((Cpad, Ppad), jnp.float32)
           .at[:inplanes, :planes].set(w1f)).astype(jnp.bfloat16)
    w2p = (jnp.zeros((3, 3, Ppad, Ppad), jnp.float32)
           .at[:, :, :planes, :planes].set(w2f))
    w2p = w2p.reshape(9 * Ppad, Ppad).astype(jnp.bfloat16)   # row = (ky*3+kx)*Ppad + cin
    w3p = (jnp.zeros((Ppad, Cpad), jnp.float32)
           .at[:planes, :cout].set(w3f)).astype(jnp.bfloat16)

    bias = (jnp.zeros((3, Cmax), jnp.float32)
            .at[0, :planes].set(b1)
            .at[1, :planes].set(b2)
            .at[2, :cout].set(b3))

    return dict(
        w1=w1, w2_hwio=w2_hwio, w3=w3, bn1=bn1, bn2=bn2, bn3=bn3, eps=eps,
        w1p=w1p, w2p=w2p, w3p=w3p, bias=bias,
    )


# ----------------------------------------------------------------------------
# Pure-JAX reference (eval-mode Bottleneck, f32, NHWC) for correctness check
# ----------------------------------------------------------------------------
def bottleneck_ref_nhwc(x, p):
    eps = p['eps']
    dn = ('NHWC', 'HWIO', 'NHWC')

    def bn(h, stats):
        g, b, m, v = stats
        return (h - m) / jnp.sqrt(v + eps) * g + b

    w1 = p['w1'][None, None]
    w3 = p['w3'][None, None]

    h = lax.conv_general_dilated(x, w1, (1, 1), 'VALID', dimension_numbers=dn)
    h = jnp.maximum(bn(h, p['bn1']), 0.0)
    h = lax.conv_general_dilated(h, p['w2_hwio'], (1, 1),
                                 ((1, 1), (1, 1)), dimension_numbers=dn)
    h = jnp.maximum(bn(h, p['bn2']), 0.0)
    h = lax.conv_general_dilated(h, w3, (1, 1), 'VALID', dimension_numbers=dn)
    h = bn(h, p['bn3'])
    return jnp.maximum(h + x, 0.0)


# ----------------------------------------------------------------------------
if __name__ == "__main__":
    key = jax.random.PRNGKey(0)
    kx, kp = jax.random.split(key)

    B, planes, H, W = 2, 8, 16, 16
    inplanes = planes * 4                       # 32, so the residual add is valid
    x_nhwc = jax.random.normal(kx, (B, H, W, inplanes), jnp.float32)

    params = make_params(kp, inplanes, planes)
    ref = bottleneck_ref_nhwc(x_nhwc, params)

    # Hot path: NHWC, bf16 activations, 2 row blocks per image (exercises the
    # interior halo as well as the top/bottom boundary masking).
    fwd = jax.jit(lambda xx: bottleneck_pallas_nhwc(
        xx.astype(jnp.bfloat16), params, rows=8))
    out = jax.block_until_ready(fwd(x_nhwc))
    assert out.shape == x_nhwc.shape
    # bf16 activations + bf16 MXU matmuls vs f32 reference -> loosened tolerance.
    np.testing.assert_allclose(np.asarray(out.astype(jnp.float32)),
                               np.asarray(ref), rtol=5e-2, atol=5e-2)

    # PyTorch-layout adapter (NCHW), default row blocking (single row block).
    x_nchw = jnp.transpose(x_nhwc, (0, 3, 1, 2))
    fwd2 = jax.jit(lambda xx: bottleneck_pallas(xx, params))
    out2 = jax.block_until_ready(fwd2(x_nchw))
    ref2 = jnp.transpose(ref, (0, 3, 1, 2))
    np.testing.assert_allclose(np.asarray(out2.astype(jnp.float32)),
                               np.asarray(ref2), rtol=5e-2, atol=5e-2)

    print("KERNEL_OK")
</pallas_src>

<mosaic_0001>
module attributes {stable_mosaic.version = 11 : i64} {
  func.func @_bottleneck_kernel(%arg0: i32, %arg1: i32, %arg2: memref<1x1x16x128xbf16, #tpu.memory_space<vmem>>, %arg3: memref<1x8x16x128xbf16, #tpu.memory_space<vmem>>, %arg4: memref<1x1x16x128xbf16, #tpu.memory_space<vmem>>, %arg5: memref<128x128xbf16, #tpu.memory_space<vmem>>, %arg6: memref<1152x128xbf16, #tpu.memory_space<vmem>>, %arg7: memref<128x128xbf16, #tpu.memory_space<vmem>>, %arg8: memref<3x128xf32, #tpu.memory_space<vmem>>, %arg9: memref<1x8x16x128xbf16, #tpu.memory_space<vmem>>) attributes {dimension_semantics = [#tpu.dimension_semantics<parallel>, #tpu.dimension_semantics<parallel>], iteration_bounds = array<i64: 2, 2>, scalar_prefetch = 0 : i64, scratch_operands = 0 : i64, tpu.core_type = #tpu.core_type<tc>, window_params = [{transform_indices = @transform_0, window_bounds = array<i64: 1, 1, 16, 128>}, {transform_indices = @transform_1, window_bounds = array<i64: 1, 8, 16, 128>}, {transform_indices = @transform_2, window_bounds = array<i64: 1, 1, 16, 128>}, {pipeline_mode = #tpu.pipeline_mode<synchronous>, transform_indices = @transform_3, window_bounds = array<i64: 128, 128>}, {pipeline_mode = #tpu.pipeline_mode<synchronous>, transform_indices = @transform_4, window_bounds = array<i64: 1152, 128>}, {pipeline_mode = #tpu.pipeline_mode<synchronous>, transform_indices = @transform_5, window_bounds = array<i64: 128, 128>}, {pipeline_mode = #tpu.pipeline_mode<synchronous>, transform_indices = @transform_6, window_bounds = array<i64: 3, 128>}, {transform_indices = @transform_7, window_bounds = array<i64: 1, 8, 16, 128>}]} {
    %c0 = arith.constant 0 : index
    %c0_0 = arith.constant 0 : index
    %c0_1 = arith.constant 0 : index
    %c0_2 = arith.constant 0 : index
    %0 = vector.load %arg2[%c0, %c0_0, %c0_1, %c0_2] : memref<1x1x16x128xbf16, #tpu.memory_space<vmem>>, vector<1x1x16x128xbf16>
    %1 = vector.shape_cast %0 : vector<1x1x16x128xbf16> to vector<16x128xbf16>
    %c0_3 = arith.constant 0 : index
    %c0_4 = arith.constant 0 : index
    %c0_5 = arith.constant 0 : index
    %c0_6 = arith.constant 0 : index
    %2 = vector.load %arg3[%c0_3, %c0_4, %c0_5, %c0_6] : memref<1x8x16x128xbf16, #tpu.memory_space<vmem>>, vector<1x8x16x128xbf16>
    %3 = vector.shape_cast %2 : vector<1x8x16x128xbf16> to vector<8x16x128xbf16>
    %4 = vector.shape_cast %3 : vector<8x16x128xbf16> to vector<128x128xbf16>
    %c0_7 = arith.constant 0 : index
    %c0_8 = arith.constant 0 : index
    %c0_9 = arith.constant 0 : index
    %c0_10 = arith.constant 0 : index
    %5 = vector.load %arg4[%c0_7, %c0_8, %c0_9, %c0_10] : memref<1x1x16x128xbf16, #tpu.memory_space<vmem>>, vector<1x1x16x128xbf16>
    %6 = vector.shape_cast %5 : vector<1x1x16x128xbf16> to vector<16x128xbf16>
    %7 = tpu.concatenate %1, %4, %6 in 0 : vector<16x128xbf16>, vector<128x128xbf16>, vector<16x128xbf16> -> vector<160x128xbf16>
    %c0_11 = arith.constant 0 : index
    %c0_12 = arith.constant 0 : index
    %8 = vector.load %arg5[%c0_11, %c0_12] : memref<128x128xbf16, #tpu.memory_space<vmem>>, vector<128x128xbf16>
    %cst = arith.constant dense<0.000000e+00> : vector<160x128xf32>
    %9 = tpu.matmul %7, %8, %cst {dimension_numbers = #tpu.dot_dimension_numbers<[1], [0], [0], [1], [0, 0, 1, 1], [], []>} : vector<160x128xbf16>, vector<128x128xbf16>, vector<160x128xf32> -> vector<160x128xf32>
    %c0_13 = arith.constant 0 : index
    %c0_14 = arith.constant 0 : index
    %10 = vector.load %arg8[%c0_13, %c0_14] : memref<3x128xf32, #tpu.memory_space<vmem>>, vector<1x128xf32>
    %11 = vector.broadcast %10 : vector<1x128xf32> to vector<160x128xf32>
    %12 = arith.addf %9, %11 : vector<160x128xf32>
    %cst_15 = arith.constant 0.000000e+00 : f32
    %13 = vector.broadcast %cst_15 : f32 to vector<160x128xf32>
    %14 = arith.maximumf %12, %13 : vector<160x128xf32>
    %15 = tpu.iota {dimensions = array<i32: 0>} : vector<160x1xi32>
    %c0_i32 = arith.constant 0 : i32
    %16 = arith.cmpi sgt, %arg1, %c0_i32 : i32
    %c16_i32 = arith.constant 16 : i32
    %17 = vector.broadcast %c16_i32 : i32 to vector<160x1xi32>
    %18 = arith.cmpi sge, %15, %17 : vector<160x1xi32>
    %19 = vector.broadcast %16 : i1 to vector<160x1xi1>
    %20 = arith.ori %19, %18 : vector<160x1xi1>
    %c1_i32 = arith.constant 1 : i32
    %21 = arith.cmpi slt, %arg1, %c1_i32 : i32
    %c144_i32 = arith.constant 144 : i32
    %22 = vector.broadcast %c144_i32 : i32 to vector<160x1xi32>
    %23 = arith.cmpi slt, %15, %22 : vector<160x1xi32>
    %24 = vector.broadcast %21 : i1 to vector<160x1xi1>
    %25 = arith.ori %24, %23 : vector<160x1xi1>
    %26 = arith.andi %20, %25 : vector<160x1xi1>
    %cst_16 = arith.constant 0.000000e+00 : f32
    %27 = vector.shape_cast %26 : vector<160x1xi1> to vector<160x1xi1>
    %28 = vector.broadcast %27 : vector<160x1xi1> to vector<160x128xi1>
    %29 = vector.broadcast %cst_16 : f32 to vector<160x128xf32>
    %30 = arith.select %28, %14, %29 : vector<160x128xi1>, vector<160x128xf32>
    %31 = arith.truncf %30 : vector<160x128xf32> to vector<160x128xbf16>
    %c16_i32_17 = arith.constant 16 : i32
    %c0_i32_18 = arith.constant 0 : i32
    %32 = arith.cmpi eq, %c16_i32_17, %c0_i32_18 : i32
    %c1_i32_19 = arith.constant 1 : i32
    %33 = arith.select %32, %c1_i32_19, %c16_i32_17 : i32
    %34 = vector.broadcast %33 : i32 to vector<160x1xi32>
    %35 = arith.remsi %15, %34 : vector<160x1xi32>
    %c0_i32_20 = arith.constant 0 : i32
    %36 = vector.broadcast %c0_i32_20 : i32 to vector<160x1xi32>
    %37 = arith.cmpi ne, %35, %36 : vector<160x1xi32>
    %c0_i32_21 = arith.constant 0 : i32
    %38 = vector.broadcast %c0_i32_21 : i32 to vector<160x1xi32>
    %39 = arith.cmpi slt, %35, %38 : vector<160x1xi32>
    %c0_i32_22 = arith.constant 0 : i32
    %40 = arith.cmpi slt, %33, %c0_i32_22 : i32
    %41 = vector.broadcast %40 : i1 to vector<160x1xi1>
    %42 = vector.broadcast %41 : vector<160x1xi1> to vector<160x1xi1>
    %43 = arith.xori %39, %42 : vector<160x1xi1>
    %44 = arith.andi %43, %37 : vector<160x1xi1>
    %45 = vector.broadcast %33 : i32 to vector<160x1xi32>
    %46 = arith.addi %35, %45 : vector<160x1xi32>
    %47 = arith.select %44, %46, %35 : vector<160x1xi1>, vector<160x1xi32>
    %cst_23 = arith.constant 0.000000e+00 : bf16
    %48 = vector.broadcast %cst_23 : bf16 to vector<1x128xbf16>
    %c0_i32_24 = arith.constant 0 : i32
    %49 = vector.broadcast %c0_i32_24 : i32 to vector<160x1xi32>
    %50 = arith.cmpi ne, %47, %49 : vector<160x1xi32>
    %51 = vector.extract_strided_slice %31 {offsets = [0, 0], sizes = [159, 128], strides = [1, 1]} : vector<160x128xbf16> to vector<159x128xbf16>
    %52 = tpu.concatenate %48, %51 in 0 : vector<1x128xbf16>, vector<159x128xbf16> -> vector<160x128xbf16>
    %c0_i32_25 = arith.constant 0 : i32
    %53 = arith.sitofp %c0_i32_25 : i32 to bf16
    %54 = vector.shape_cast %50 : vector<160x1xi1> to vector<160x1xi1>
    %55 = vector.broadcast %54 : vector<160x1xi1> to vector<160x128xi1>
    %56 = vector.broadcast %53 : bf16 to vector<160x128xbf16>
    %57 = arith.select %55, %52, %56 : vector<160x128xi1>, vector<160x128xbf16>
    %c15_i32 = arith.constant 15 : i32
    %58 = vector.broadcast %c15_i32 : i32 to vector<160x1xi32>
    %59 = arith.cmpi ne, %47, %58 : vector<160x1xi32>
    %60 = vector.extract_strided_slice %31 {offsets = [1, 0], sizes = [159, 128], strides = [1, 1]} : vector<160x128xbf16> to vector<159x128xbf16>
    %61 = tpu.concatenate %60, %48 in 0 : vector<159x128xbf16>, vector<1x128xbf16> -> vector<160x128xbf16>
    %c0_i32_26 = arith.constant 0 : i32
    %62 = arith.sitofp %c0_i32_26 : i32 to bf16
    %63 = vector.shape_cast %59 : vector<160x1xi1> to vector<160x1xi1>
    %64 = vector.broadcast %63 : vector<160x1xi1> to vector<160x128xi1>
    %65 = vector.broadcast %62 : bf16 to vector<160x128xbf16>
    %66 = arith.select %64, %61, %65 : vector<160x128xi1>, vector<160x128xbf16>
    %67 = vector.extract_strided_slice %57 {offsets = [0, 0], sizes = [128, 128], strides = [1, 1]} : vector<160x128xbf16> to vector<128x128xbf16>
    %c0_27 = arith.constant 0 : index
    %c0_28 = arith.constant 0 : index
    %68 = vector.load %arg6[%c0_27, %c0_28] : memref<1152x128xbf16, #tpu.memory_space<vmem>>, vector<128x128xbf16>
    %cst_29 = arith.constant dense<0.000000e+00> : vector<128x128xf32>
    %69 = tpu.matmul %67, %68, %cst_29 {dimension_numbers = #tpu.dot_dimension_numbers<[1], [0], [0], [1], [0, 0, 1, 1], [], []>} : vector<128x128xbf16>, vector<128x128xbf16>, vector<128x128xf32> -> vector<128x128xf32>
    %70 = vector.extract_strided_slice %31 {offsets = [0, 0], sizes = [128, 128], strides = [1, 1]} : vector<160x128xbf16> to vector<128x128xbf16>
    %c128 = arith.constant 128 : index
    %c0_30 = arith.constant 0 : index
    %71 = vector.load %arg6[%c128, %c0_30] : memref<1152x128xbf16, #tpu.memory_space<vmem>>, vector<128x128xbf16>
    %cst_31 = arith.constant dense<0.000000e+00> : vector<128x128xf32>
    %72 = tpu.matmul %70, %71, %cst_31 {dimension_numbers = #tpu.dot_dimension_numbers<[1], [0], [0], [1], [0, 0, 1, 1], [], []>} : vector<128x128xbf16>, vector<128x128xbf16>, vector<128x128xf32> -> vector<128x128xf32>
    %73 = arith.addf %69, %72 : vector<128x128xf32>
    %74 = vector.extract_strided_slice %66 {offsets = [0, 0], sizes = [128, 128], strides = [1, 1]} : vector<160x128xbf16> to vector<128x128xbf16>
    %c256 = arith.constant 256 : index
    %c0_32 = arith.constant 0 : index
    %75 = vector.load %arg6[%c256, %c0_32] : memref<1152x128xbf16, #tpu.memory_space<vmem>>, vector<128x128xbf16>
    %cst_33 = arith.constant dense<0.000000e+00> : vector<128x128xf32>
    %76 = tpu.matmul %74, %75, %cst_33 {dimension_numbers = #tpu.dot_dimension_numbers<[1], [0], [0], [1], [0, 0, 1, 1], [], []>} : vector<128x128xbf16>, vector<128x128xbf16>, vector<128x128xf32> -> vector<128x128xf32>
    %77 = arith.addf %73, %76 : vector<128x128xf32>
    %78 = vector.extract_strided_slice %57 {offsets = [16, 0], sizes = [128, 128], strides = [1, 1]} : vector<160x128xbf16> to vector<128x128xbf16>
    %c384 = arith.constant 384 : index
    %c0_34 = arith.constant 0 : index
    %79 = vector.load %arg6[%c384, %c0_34] : memref<1152x128xbf16, #tpu.memory_space<vmem>>, vector<128x128xbf16>
    %cst_35 = arith.constant dense<0.000000e+00> : vector<128x128xf32>
    %80 = tpu.matmul %78, %79, %cst_35 {dimension_numbers = #tpu.dot_dimension_numbers<[1], [0], [0], [1], [0, 0, 1, 1], [], []>} : vector<128x128xbf16>, vector<128x128xbf16>, vector<128x128xf32> -> vector<128x128xf32>
    %81 = arith.addf %77, %80 : vector<128x128xf32>
    %82 = vector.extract_strided_slice %31 {offsets = [16, 0], sizes = [128, 128], strides = [1, 1]} : vector<160x128xbf16> to vector<128x128xbf16>
    %c512 = arith.constant 512 : index
    %c0_36 = arith.constant 0 : index
    %83 = vector.load %arg6[%c512, %c0_36] : memref<1152x128xbf16, #tpu.memory_space<vmem>>, vector<128x128xbf16>
    %cst_37 = arith.constant dense<0.000000e+00> : vector<128x128xf32>
    %84 = tpu.matmul %82, %83, %cst_37 {dimension_numbers = #tpu.dot_dimension_numbers<[1], [0], [0], [1], [0, 0, 1, 1], [], []>} : vector<128x128xbf16>, vector<128x128xbf16>, vector<128x128xf32> -> vector<128x128xf32>
    %85 = arith.addf %81, %84 : vector<128x128xf32>
    %86 = vector.extract_strided_slice %66 {offsets = [16, 0], sizes = [128, 128], strides = [1, 1]} : vector<160x128xbf16> to vector<128x128xbf16>
    %c640 = arith.constant 640 : index
    %c0_38 = arith.constant 0 : index
    %87 = vector.load %arg6[%c640, %c0_38] : memref<1152x128xbf16, #tpu.memory_space<vmem>>, vector<128x128xbf16>
    %cst_39 = arith.constant dense<0.000000e+00> : vector<128x128xf32>
    %88 = tpu.matmul %86, %87, %cst_39 {dimension_numbers = #tpu.dot_dimension_numbers<[1], [0], [0], [1], [0, 0, 1, 1], [], []>} : vector<128x128xbf16>, vector<128x128xbf16>, vector<128x128xf32> -> vector<128x128xf32>
    %89 = arith.addf %85, %88 : vector<128x128xf32>
    %90 = vector.extract_strided_slice %57 {offsets = [32, 0], sizes = [128, 128], strides = [1, 1]} : vector<160x128xbf16> to vector<128x128xbf16>
    %c768 = arith.constant 768 : index
    %c0_40 = arith.constant 0 : index
    %91 = vector.load %arg6[%c768, %c0_40] : memref<1152x128xbf16, #tpu.memory_space<vmem>>, vector<128x128xbf16>
    %cst_41 = arith.constant dense<0.000000e+00> : vector<128x128xf32>
    %92 = tpu.matmul %90, %91, %cst_41 {dimension_numbers = #tpu.dot_dimension_numbers<[1], [0], [0], [1], [0, 0, 1, 1], [], []>} : vector<128x128xbf16>, vector<128x128xbf16>, vector<128x128xf32> -> vector<128x128xf32>
    %93 = arith.addf %89, %92 : vector<128x128xf32>
    %94 = vector.extract_strided_slice %31 {offsets = [32, 0], sizes = [128, 128], strides = [1, 1]} : vector<160x128xbf16> to vector<128x128xbf16>
    %c896 = arith.constant 896 : index
    %c0_42 = arith.constant 0 : index
    %95 = vector.load %arg6[%c896, %c0_42] : memref<1152x128xbf16, #tpu.memory_space<vmem>>, vector<128x128xbf16>
    %cst_43 = arith.constant dense<0.000000e+00> : vector<128x128xf32>
    %96 = tpu.matmul %94, %95, %cst_43 {dimension_numbers = #tpu.dot_dimension_numbers<[1], [0], [0], [1], [0, 0, 1, 1], [], []>} : vector<128x128xbf16>, vector<128x128xbf16>, vector<128x128xf32> -> vector<128x128xf32>
    %97 = arith.addf %93, %96 : vector<128x128xf32>
    %98 = vector.extract_strided_slice %66 {offsets = [32, 0], sizes = [128, 128], strides = [1, 1]} : vector<160x128xbf16> to vector<128x128xbf16>
    %c1024 = arith.constant 1024 : index
    %c0_44 = arith.constant 0 : index
    %99 = vector.load %arg6[%c1024, %c0_44] : memref<1152x128xbf16, #tpu.memory_space<vmem>>, vector<128x128xbf16>
    %cst_45 = arith.constant dense<0.000000e+00> : vector<128x128xf32>
    %100 = tpu.matmul %98, %99, %cst_45 {dimension_numbers = #tpu.dot_dimension_numbers<[1], [0], [0], [1], [0, 0, 1, 1], [], []>} : vector<128x128xbf16>, vector<128x128xbf16>, vector<128x128xf32> -> vector<128x128xf32>
    %101 = arith.addf %97, %100 : vector<128x128xf32>
    %c1 = arith.constant 1 : index
    %c0_46 = arith.constant 0 : index
    %102 = vector.load %arg8[%c1, %c0_46] : memref<3x128xf32, #tpu.memory_space<vmem>>, vector<1x128xf32>
    %103 = vector.broadcast %102 : vector<1x128xf32> to vector<128x128xf32>
    %104 = arith.addf %101, %103 : vector<128x128xf32>
    %cst_47 = arith.constant 0.000000e+00 : f32
    %105 = vector.broadcast %cst_47 : f32 to vector<128x128xf32>
    %106 = arith.maximumf %104, %105 : vector<128x128xf32>
    %107 = arith.truncf %106 : vector<128x128xf32> to vector<128x128xbf16>
    %c0_48 = arith.constant 0 : index
    %c0_49 = arith.constant 0 : index
    %108 = vector.load %arg7[%c0_48, %c0_49] : memref<128x128xbf16, #tpu.memory_space<vmem>>, vector<128x128xbf16>
    %cst_50 = arith.constant dense<0.000000e+00> : vector<128x128xf32>
    %109 = tpu.matmul %107, %108, %cst_50 {dimension_numbers = #tpu.dot_dimension_numbers<[1], [0], [0], [1], [0, 0, 1, 1], [], []>} : vector<128x128xbf16>, vector<128x128xbf16>, vector<128x128xf32> -> vector<128x128xf32>
    %c0_51 = arith.constant 0 : index
    %c0_52 = arith.constant 0 : index
    %c0_53 = arith.constant 0 : index
    %c0_54 = arith.constant 0 : index
    %110 = vector.load %arg3[%c0_51, %c0_52, %c0_53, %c0_54] : memref<1x8x16x128xbf16, #tpu.memory_space<vmem>>, vector<1x8x16x128xbf16>
    %111 = vector.shape_cast %110 : vector<1x8x16x128xbf16> to vector<8x16x128xbf16>
    %112 = vector.shape_cast %111 : vector<8x16x128xbf16> to vector<128x128xbf16>
    %113 = arith.extf %112 : vector<128x128xbf16> to vector<128x128xf32>
    %c2 = arith.constant 2 : index
    %c0_55 = arith.constant 0 : index
    %114 = vector.load %arg8[%c2, %c0_55] : memref<3x128xf32, #tpu.memory_space<vmem>>, vector<1x128xf32>
    %115 = vector.broadcast %114 : vector<1x128xf32> to vector<128x128xf32>
    %116 = arith.addf %109, %115 : vector<128x128xf32>
    %117 = arith.addf %116, %113 : vector<128x128xf32>
    %cst_56 = arith.constant 0.000000e+00 : f32
    %118 = vector.broadcast %cst_56 : f32 to vector<128x128xf32>
    %119 = arith.maximumf %117, %118 : vector<128x128xf32>
    %120 = vector.shape_cast %119 : vector<128x128xf32> to vector<8x16x128xf32>
    %121 = arith.truncf %120 : vector<8x16x128xf32> to vector<8x16x128xbf16>
    %c0_57 = arith.constant 0 : index
    %c0_58 = arith.constant 0 : index
    %c0_59 = arith.constant 0 : index
    %c0_60 = arith.constant 0 : index
    %122 = vector.load %arg9[%c0_57, %c0_58, %c0_59, %c0_60] : memref<1x8x16x128xbf16, #tpu.memory_space<vmem>>, vector<1x8x16x128xbf16>
    %123 = vector.shape_cast %122 : vector<1x8x16x128xbf16> to vector<8x16x128xbf16>
    %124 = vector.shape_cast %121 : vector<8x16x128xbf16> to vector<1x8x16x128xbf16>
    tpu.vector_store %arg9[%c0_57, %c0_58, %c0_59, %c0_60], %124 {strides = array<i32>} : memref<1x8x16x128xbf16, #tpu.memory_space<vmem>>, vector<1x8x16x128xbf16>,
    return
  }
  func.func @transform_0(%arg0: i32, %arg1: i32) -> (i32, i32, i32, i32) {
    %c8_i32 = arith.constant 8 : i32
    %0 = arith.muli %arg1, %c8_i32 : i32
    %c1_i32 = arith.constant 1 : i32
    %1 = arith.subi %0, %c1_i32 : i32
    %c0_i32 = arith.constant 0 : i32
    %2 = arith.maxsi %1, %c0_i32 : i32
    %c0_i32_0 = arith.constant 0 : i32
    %c0_i32_1 = arith.constant 0 : i32
    %c0_i32_2 = arith.constant 0 : i32
    return %arg0, %2, %c0_i32_0, %c0_i32_1 : i32, i32, i32, i32
  }
  func.func @transform_1(%arg0: i32, %arg1: i32) -> (i32, i32, i32, i32) {
    %c0_i32 = arith.constant 0 : i32
    %c0_i32_0 = arith.constant 0 : i32
    %c0_i32_1 = arith.constant 0 : i32
    return %arg0, %arg1, %c0_i32, %c0_i32_0 : i32, i32, i32, i32
  }
  func.func @transform_2(%arg0: i32, %arg1: i32) -> (i32, i32, i32, i32) {
    %c8_i32 = arith.constant 8 : i32
    %0 = arith.muli %arg1, %c8_i32 : i32
    %c8_i32_0 = arith.constant 8 : i32
    %1 = arith.addi %0, %c8_i32_0 : i32
    %c15_i32 = arith.constant 15 : i32
    %2 = arith.minsi %1, %c15_i32 : i32
    %c0_i32 = arith.constant 0 : i32
    %c0_i32_1 = arith.constant 0 : i32
    %c0_i32_2 = arith.constant 0 : i32
    return %arg0, %2, %c0_i32, %c0_i32_1 : i32, i32, i32, i32
  }
  func.func @transform_3(%arg0: i32, %arg1: i32) -> (i32, i32) {
    %c0_i32 = arith.constant 0 : i32
    %c0_i32_0 = arith.constant 0 : i32
    %c0_i32_1 = arith.constant 0 : i32
    return %c0_i32, %c0_i32_0 : i32, i32
  }
  func.func @transform_4(%arg0: i32, %arg1: i32) -> (i32, i32) {
    %c0_i32 = arith.constant 0 : i32
    %c0_i32_0 = arith.constant 0 : i32
    %c0_i32_1 = arith.constant 0 : i32
    return %c0_i32, %c0_i32_0 : i32, i32
  }
  func.func @transform_5(%arg0: i32, %arg1: i32) -> (i32, i32) {
    %c0_i32 = arith.constant 0 : i32
    %c0_i32_0 = arith.constant 0 : i32
    %c0_i32_1 = arith.constant 0 : i32
    return %c0_i32, %c0_i32_0 : i32, i32
  }
  func.func @transform_6(%arg0: i32, %arg1: i32) -> (i32, i32) {
    %c0_i32 = arith.constant 0 : i32
    %c0_i32_0 = arith.constant 0 : i32
    %c0_i32_1 = arith.constant 0 : i32
    return %c0_i32, %c0_i32_0 : i32, i32
  }
  func.func @transform_7(%arg0: i32, %arg1: i32) -> (i32, i32, i32, i32) {
    %c0_i32 = arith.constant 0 : i32
    %c0_i32_0 = arith.constant 0 : i32
    %c0_i32_1 = arith.constant 0 : i32
    return %arg0, %arg1, %c0_i32, %c0_i32_0 : i32, i32, i32, i32
  }
}

</mosaic_0001>

<bundles_post_ra>
// kernel: _lambda_.1
= control target key start
LH: loop header
LB: loop body
LE: loop exit
PB: predicated region body
PF: predicated region fallthrough
CT: control target
= control target key end

     0   :  { %12 = vsyncpa [#allocation3], 0  ;;  %s6134_s0 = inlined_call_operand.vmem [shape: bf16[2,16,16,128], index: 0, kind: input, shape index: {}, may-alias: {0,1,2}]   ;;  %s6135_s1 = inlined_call_operand.vmem [shape: bf16[2,16,16,128], index: 1, kind: input, shape index: {}, may-alias: {0,1,2}]   ;;  %s6136_s2 = inlined_call_operand.vmem [shape: bf16[2,16,16,128], index: 2, kind: input, shape index: {}, may-alias: {0,1,2}]   ;;  %s6137_s3 = inlined_call_operand.vmem [shape: bf16[128,128], index: 3, kind: input, shape index: {}]   ;;  %s6138_s4 = inlined_call_operand.vmem [shape: bf16[1152,128], index: 4, kind: input, shape index: {}]   ;;  %s6139_s5 = inlined_call_operand.vmem [shape: bf16[128,128], index: 5, kind: input, shape index: {}]   ;;  %s6140_s6 = inlined_call_operand.vmem [shape: f32[3,128], index: 6, kind: input, shape index: {}]   ;;  %s6141_s7 = inlined_call_operand.hbm [shape: bf16[2,16,16,128], index: 7, kind: output, shape index: {}]  }
   0x1   :  { %14 = vsyncpa [#allocation3 + $0x1], 0  ;;  %s4928_s24 = smov 0   ;;  %s4930_s25 = smov 0  }
   0x2   :  { %s4932_s26 = smov 0   ;;  %s4934_s27 = smov 0  }
   0x3   :  { %s4936_s28 = smov 0   ;;  %s4938_s29 = smov 0  }
   0x4   :  { %s4940_s30 = smov 0   ;;  %s4942_s8 = smov 0  }
   0x5 LB: > { %6147 = sst [smem:[#allocation5_spill]] %s4873_s29  ;;  %s3639_s9 = sadd.s32 4294967295, %s4881_s8   ;;  %s4881_s8 = sphi %s4942_s8, %s20_s8   ;;  %s4877_s30 = sphi %s4940_s30, %s6234_s30   ;;  %s4873_s29 = sphi %s4938_s29, %s6229_s29   ;;  %s4869_s28 = sphi %s4936_s28, %s6228_s28   ;;  %s4865_s27 = sphi %s4934_s27, %s6227_s27   ;;  %s4861_s26 = sphi %s4932_s26, %s6233_s26   ;;  %s4857_s25 = sphi %s4930_s25, %s6232_s25   ;;  %s4853_s24 = sphi %s4928_s24, %s6231_s24  }
   0x6   : > { %6148 = sst [smem:[#allocation6_spill]] %s4877_s30  ;;  %s3640_s10 = sadd.s32 4294967294, %s4881_s8  }
   0x7   : > { %s29_s11 = sadd.s32 1, %s4873_s29  ;;  %s32_s12 = sadd.s32 1, %s4877_s30 }
   0x8   : > { %p30_p0 = scmp.ge.s32.totalorder %s29_s11, 2  ;;  %p235_p1 = scmp.ne.s32.totalorder %s4861_s26, %s4857_s25 }
   0x9   : > { %p236_p2 = scmp.eq.s32.totalorder %s3639_s9, 3  ;;  %p241_p5 = scmp.ne.s32.totalorder %s4857_s25, %s4853_s24 }
   0xa   : > { %s6236_s11 = smov (%p30_p0, %s29_s11), 0  ;;  %s6238_s12 = smov (!%p30_p0, %s32_s12), %s4877_s30 }
   0xb   : > { %6149 = sst [smem:[#allocation7_spill]] %s6236_s11  ;;  %s221_s13 = ssub.s32 %s4873_s29, %s6236_s11 }
   0xc   : > { %p4979_p3 = por %p236_p2, %p235_p1  ;;  %p34_p4 = scmp.ge.s32.totalorder %s6238_s12, 2 }
   0xd   : > { %p242_p6 = scmp.eq.s32.totalorder %s3640_s10, 3  ;;  %p3649_p7 = scmp.ge.s32.totalorder %s4881_s8, 1 }
   0xe   : > { %s6240_s12 = smov (%p34_p4, %s6238_s12), 0  ;;  %p326_p9 = scmp.lt.s32.totalorder %s4881_s8, 5 }
   0xf   : > { %6151 = sst [smem:[#allocation8_spill]] %s6240_s12  ;;  %p4988_p8 = por %p242_p6, %p241_p5 }
  0x10   : > { %s220_s16 = ssub.s32 %s4877_s30, %s6240_s12  ;;  %s225_s17 = sadd.s32 1, %s4861_s26 }
  0x11   : > { %s222_s18 = sor.u32 %s221_s13, %s220_s16  ;;  %p327_p10 = pnand %p3649_p7, %p326_p9 }
  0x12   : > { %p223_p11 = scmp.eq.s32.totalorder %s222_s18, 0  ;;  %v4673_v0 = vld [vmem:[%s6137_s3] sm:$0xff] (!%p327_p10)   ;;  %s5003_s22 = sshll.u32 (!%p327_p10), %s4865_s27, 3  ;;  %v4674_v1 = vld [vmem:[%s6137_s3 + $0x8] sm:$0xff] (!%p327_p10)   ;;  %v4675_v2 = vld [vmem:[%s6137_s3 + $0x10] sm:$0xff] (!%p327_p10)   ;;  %v720_v36 = vlaneseq (!%p327_p10)  ;;  %vm4883_vm1 = vmmov (!%p327_p10), 1  }
  0x13   : > { %330 = sbr.rel (%p327_p10) target bundleno = 934 (0x3a6), region = 48  ;;  %s3652_s10 = sadd.s32 (!%p327_p10), 4294967295, %s5003_s22  ;;  %4114 = vmatprep.subr.bf16.mxu0 (!%p327_p10), %v4673_v0  ;;  %v4676_v3 = vld [vmem:[%s6137_s3 + $0x18] sm:$0xff] (!%p327_p10)   ;;  %v4677_v4 = vld [vmem:[%s6137_s3 + $0x20] sm:$0xff] (!%p327_p10)   ;;  %v4678_v7 = vld [vmem:[%s6137_s3 + $0x28] sm:$0xff] (!%p327_p10)   ;;  %v4884_v45 = vmov (!%p327_p10), 0  }
  0x14   : > { %s4997_s19 = scalar_select %p223_p11, %s4861_s26, %s225_s17  }
  0x15   : > { %p391_p12 = scmp.gt.s32.totalorder (!%p327_p10), %s3652_s10, 0  ;;  %4115 = vmatpush3.bf16.msra.mxu0 (!%p327_p10), %v4673_v0  ;;  %p393_p13 = scmp.lt.s32.totalorder (!%p327_p10), %s4869_s28, 1  ;;  %v4695_v5 = vld [vmem:[%s6138_s4 + $0xc0] sm:$0xff] (!%p327_p10)   ;;  %v4697_v8 = vld [vmem:[%s6138_s4 + $0xc8] sm:$0xff] (!%p327_p10)   ;;  %v4679_v9 = vld [vmem:[%s6137_s3 + $0x30] sm:$0xff] (!%p327_p10)   ;;  %v5132_v37 = vshrl.u32 (!%p327_p10), %v720_v36, 7 }
  0x16   : > { %6153 = sst [smem:[#allocation9_spill]] %s4997_s19  ;;  %4116 = vmatprep.subr.bf16.mxu0 (!%p327_p10), %v4674_v1  ;;  %p3653_p0 = scmp.lt.s32.totalorder (!%p327_p10), %s3652_s10, 15  ;;  %4246 = vmatprep.subr.bf16.mxu1 (!%p327_p10), %v4695_v5  ;;  %v4680_v10 = vld [vmem:[%s6137_s3 + $0x38] sm:$0xff] (!%p327_p10)   ;;  %v4691_v13 = vld [vmem:[%s6138_s4 + $0x40] sm:$0xff] (!%p327_p10)   ;;  %v4692_v14 = vld [vmem:[%s6138_s4 + $0x48] sm:$0xff] (!%p327_p10)  }
  0x17   : > { %p409_p1 = scmp.lt.s32.totalorder (!%p327_p10), %s5003_s22, 15  ;;  %s418_s9 = sadd.s32 (!%p327_p10), 8, %s5003_s22  ;;  %4247 = vmatpush3.bf16.msra.mxu1 (!%p327_p10), %v4695_v5  ;;  %v4693_v17 = vld [vmem:[%s6138_s4 + $0x50] sm:$0xff] (!%p327_p10)   ;;  %v4694_v18 = vld [vmem:[%s6138_s4 + $0x58] sm:$0xff] (!%p327_p10)   ;;  %v4696_v21 = vld [vmem:[%s6138_s4 + $0x60] sm:$0xff] (!%p327_p10)   ;;  %v723_v38 = vadd.s32 (!%p327_p10), 16, %v5132_v37 }
  0x18   : > { %p5021_p2 = scmp.lt.s32.totalorder (!%p327_p10), %s418_s9, 15  ;;  %4248 = vmatprep.subr.bf16.mxu1 (!%p327_p10), %v4697_v8  ;;  %v4698_v22 = vld [vmem:[%s6138_s4 + $0x68] sm:$0xff] (!%p327_p10)   ;;  %v4699_v26 = vld [vmem:[%s6138_s4 + $0xd0] sm:$0xff] (!%p327_p10)   ;;  %v4701_v28 = vld [vmem:[%s6138_s4 + $0xd8] sm:$0xff] (!%p327_p10)   ;;  %v725_v40 = vadd.s32 (!%p327_p10), 32, %v5132_v37  ;;  %p741_p4 = scmp.gt.s32.totalorder (!%p327_p10), %s4865_s27, 0 }
  0x19   : > { %4117 = vmatpush3.bf16.msra.mxu0 (!%p327_p10), %v4674_v1  ;;  %v4700_v27 = vld [vmem:[%s6138_s4 + $0x70] sm:$0xff] (!%p327_p10)   ;;  %v4702_v29 = vld [vmem:[%s6138_s4 + $0x78] sm:$0xff] (!%p327_p10)   ;;  %v4703_v30 = vld [vmem:[%s6138_s4 + $0xe0] sm:$0xff] (!%p327_p10)   ;;  %v937_v39 = vand.u32 (!%p327_p10), 15, %v723_v38  ;;  %v727_v42 = vadd.s32 (!%p327_p10), 48, %v5132_v37  ;;  %v729_v55 = vadd.s32 (!%p327_p10), 64, %v5132_v37 }
  0x1a   : > { %s392_s17 = scalar_select %p391_p12, %s3652_s10, 0  ;;  %4118 = vmatprep.subr.bf16.mxu0 %v4675_v2  ;;  %v5114_v31 = vld [vmem:[%s6138_s4] sm:$0xff]   ;;  %v4705_v32 = vld [vmem:[%s6138_s4 + $0xe8] sm:$0xff]   ;;  %v4707_v33 = vld [vmem:[%s6138_s4 + $0xf0] sm:$0xff]   ;;  %v951_v41 = vand.u32 15, %v725_v40 }
  0x1b   : > { %s394_s18 = scalar_select %p393_p13, %s4869_s28, 1  ;;  %4249 = vmatpush3.bf16.msra.mxu1 %v4697_v8  ;;  %v4709_v34 = vld [vmem:[%s6138_s4 + $0xf8] sm:$0xff]   ;;  %v5129_v35 = vld [vmem:[%s6138_s4 + $0x100] sm:$0xff]   ;;  %vm1161_vm0 = vcmp.ne.s32.totalorder %v937_v39, 0  ;;  %vm1313_vm2 = vmpackc.low %vm4883_vm1, %vm4883_vm1  ;;  %v965_v49 = vand.u32 15, %v727_v42 }
  0x1c   : > { %s6242_s17 = smov (!%p3653_p0, %s392_s17), 15  ;;  %s6244_s22 = smov (!%p409_p1, %s5003_s22), 15  ;;  %4250 = vmatprep.subr.bf16.mxu1 %v4699_v26  ;;  %vm1314_vm3 = vmpackc.low %vm1161_vm0, %vm1161_vm0  ;;  %v5141_v43 = vld [vmem:[%s6140_s6] ss:$0 sm:$0xff]  ;;  %v5144_v46 = vsel %vm1313_vm2, 65537, %v4884_v45  ;;  %vm5147_vm4 = vcmp.ne.s32.totalorder %v951_v41, 0 }
  0x1d   : > { %s5014_s20 = sshll.u32 %s394_s18, 5  ;;  %s3658_s12 = sshll.u32 %s6242_s17, 1  ;;  %4119 = vmatpush3.bf16.msra.mxu0 %v4675_v2  ;;  %v1334_v47 = vsel %vm1314_vm3, 65537, %v4884_v45  ;;  %vm1316_vm5 = vmpackc.low %vm5147_vm4, %vm5147_vm4  ;;  %vm5160_vm6 = vcmp.ne.s32.totalorder %v965_v49, 0  ;;  %vm1179_vm9 = vsmask.f32 256 }
  0x1e   : > { %s399_s10 = sadd.s32 %s5014_s20, %s3658_s12  ;;  %4120 = vmatprep.subr.bf16.mxu0 %v4676_v3  ;;  %s6246_s9 = smov (!%p5021_p2, %s418_s9), 15  ;;  %v3692_v58 = vcombine.low %v1334_v47, %v5144_v46  ;;  %v5172_v2 = vsel %vm1316_vm5, 65537, %v4884_v45  ;;  %vm1318_vm11 = vmpackc.low %vm5160_vm6, %vm5160_vm6  ;;  %vm1422_vm12 = vsmask.f32 7424  ;;  %v735_v47 = vadd.s32 112, %v5132_v37  ;;  %v4749_v63 = vld [vmem:[%s6138_s4 + $0x1d0] sm:$0xff]  }
  0x1f   : > { %s3660_s11 = sshll.u32 %s399_s10, 2  ;;  %s3662_s10 = sshll.u32 %s6244_s22, 1  ;;  %4251 = vmatpush3.bf16.msra.mxu1 %v4699_v26  ;;  %v923_v26 = vand.u32 15, %v5132_v37 }
  0x20   : > { %s401_s30 = scalar_lea.vmem %s6134_s0, %s3660_s11  ;;  %s413_s29 = sadd.s32 %s3662_s10, %s5014_s20  ;;  %4252 = vmatprep.subr.bf16.mxu1 %v4701_v28  ;;  %vm5177_vm10 = vcmp.ne.s16.totalorder %v3692_v58, 0 }
  0x21   : > { %v4681_v6 = vld [vmem:[%s401_s30] sm:$0xff]   ;;  %4121 = vmatpush3.bf16.msra.mxu0 %v4676_v3  ;;  %s3664_s30 = sshll.u32 %s413_s29, 2  ;;  %s6248_s9 = smov (!%p5021_p2, %s6246_s9), 15  ;;  %v979_v3 = vand.u32 15, %v729_v55  ;;  %vm5260_vm0 = vcmp.ne.s32.totalorder %v923_v26, 0 }
  0x22   : > { %4122 = vmatprep.subr.bf16.mxu0 %v4677_v4  ;;  %4130 = vmatprep.mubr.bf16.mxu0 %v4681_v6  ;;  %s5053_s23 = scalar_lea.vmem %s6135_s1, %s3664_s30  ;;  %s3669_s17 = sshll.u32 %s6248_s9, 1  ;;  %vm1312_vm3 = vmpackc.low %vm5260_vm0, %vm5260_vm0  ;;  %v4724_v6 = vld [vmem:[%s6138_s4 + $0x90] sm:$0xff]  }
  0x23   : > { %s427_s12 = sadd.s32 %s3669_s17, %s5014_s20  ;;  %v440_v11 = vld [vmem:[%s5053_s23] sm:$0xff]   ;;  %v442_v12 = vld [vmem:[%s5053_s23 + $0x8] sm:$0xff]   ;;  %v444_v15 = vld [vmem:[%s5053_s23 + $0x10] sm:$0xff]   ;;  %4253 = vmatpush3.bf16.msra.mxu1 %v4701_v28  ;;  %vm5206_vm13 = vcmp.ne.s32.totalorder %v979_v3, 0  ;;  %p785_p5 = scmp.lt.s32.totalorder %s4865_s27, 1 }
  0x24   : > { %s5059_s13 = sshll.u32 %s427_s12, 2  ;;  %v446_v16 = vld [vmem:[%s5053_s23 + $0x18] sm:$0xff]   ;;  %v448_v19 = vld [vmem:[%s5053_s23 + $0x20] sm:$0xff]   ;;  %v450_v20 = vld [vmem:[%s5053_s23 + $0x28] sm:$0xff]   ;;  %4254 = vmatprep.subr.bf16.mxu1 %v4703_v30  ;;  %s386_s18 = sand.u32 1, %s4857_s25  }
  0x25   : > { %4123 = vmatpush3.bf16.msra.mxu0 %v4677_v4  ;;  %s429_s30 = scalar_lea.vmem %s6136_s2, %s5059_s13  ;;  %v452_v23 = vld [vmem:[%s5053_s23 + $0x30] sm:$0xff]   ;;  %v454_v24 = vld [vmem:[%s5053_s23 + $0x38] sm:$0xff]   ;;  %v731_v4 = vadd.s32 80, %v5132_v37  ;;  %vm1320_vm14 = vmpackc.low %vm5206_vm13, %vm5206_vm13  ;;  %s3650_s19 = sshll.u32 %s386_s18, 6 }
  0x26   : > { %4124 = vmatprep.subr.bf16.mxu0 %v4678_v7  ;;  %v4690_v25 = vld [vmem:[%s429_s30] sm:$0xff]   ;;  %s762_s10 = scalar_select %p741_p4, 1, 0 }
  0x27   : > { %4255 = vmatpush3.bf16.msra.mxu1 %v4703_v30  ;;  %v733_v30 = vadd.s32 96, %v5132_v37  ;;  %s5376_s11 = scalar_select %p785_p5, 1, 0 }
  0x28   : > { %4256 = vmatprep.subr.bf16.mxu1 %v4705_v32  ;;  %v763_v53 = vstv %s762_s10  ;;  %s6046_s20 = scalar_lea.vmem [#allocation2], %s3650_s19  ;;  %s3888_s9 = sshll.u32 %s4865_s27, 4 }
  0x29   : > { %4125 = vmatpush3.bf16.msra.mxu0 %v4678_v7  ;;  %vm5164_vm7 = vcmp.eq.s32.totalorder %v763_v53, 1  ;;  %s3866_s21 = sshll.u32 %s4869_s28, 5  ;;  %s3512_s28 = sshll.u32 %s6046_s20, 4  ;;  %s6076_s28 = int_to_ptr.vmem [resolvable:$true] %s3512_s28 }
  0x2a   : > { %4126 = vmatprep.subr.bf16.mxu0 %v4679_v9  ;;  %vm3719_vm8 = vmpackc.low %vm5164_vm7, %vm5164_vm7  ;;  %s6082_s13 = scalar_lea.sflag [#allocation3], %s386_s18  ;;  %s4787_s30 = scalar_lea.vmem %s6076_s28, 1024 }
  0x2b   : > { %4257 = vmatpush3.bf16.msra.mxu1 %v4705_v32  ;;  %p4788_p6 = scmp.ne.s32.totalorder %s6076_s28, %s4787_s30  ;;  %s4885_s10 = smov [#allocation2]  }
  0x2c   : > { %4258 = vmatprep.subr.bf16.mxu1 %v4707_v33 }
  0x2d   : > { %4127 = vmatpush3.bf16.msra.mxu0 %v4679_v9  ;;  %p4789_p7 = pnand %p4788_p6, %p4979_p3 }
  0x2e   : > { %4128 = vmatprep.subr.bf16.mxu0 %v4680_v10 }
  0x2f   : > { %4259 = vmatpush3.bf16.msra.mxu1 %v4707_v33  ;;  %p4790_p9 = pneg %p4789_p7 }
  0x30   : > { %4260 = vmatprep.subr.bf16.mxu1 %v4709_v34 }
  0x31   : > { %4129 = vmatpush3.bf16.msra.mxu0 %v4680_v10 }
  0x32   : > { %4150 = vmatprep.subr.bf16.mxu0 %v4691_v13 }
  0x33   : > { %4261 = vmatpush3.bf16.msra.mxu1 %v4709_v34 }
  0x34   : > { %4131 = vmatmul.mubr.bf16.vlgmr.msra.gmra.mrb[0].mxu0 %v440_v11  ;;  %4278 = vmatprep.subr.bf16.mxu1 %v5129_v35 }
  0x35   : > { %4134 = vmatprep.mubr.bf16.mxu0 %v442_v12  ;;  %4151 = vmatpush3.bf16.msra.mxu0 %v4691_v13 }
  0x36   : > { %4152 = vmatprep.subr.bf16.mxu0 %v4692_v14 }
  0x39   : > { %4153 = vmatpush3.bf16.msra.mxu0 %v4692_v14  ;;  %v4706_v14 = vld [vmem:[%s6138_s4 + $0x8] sm:$0xff]  }
  0x3a   : > { %4154 = vmatprep.subr.bf16.mxu0 %v4693_v17 }
  0x3c   : > { %4135 = vmatmul.mubr.bf16.gmra.mrb[4].mxu0 %v444_v15 }
  0x3d   : > { %4138 = vmatprep.mubr.bf16.mxu0 %v446_v16  ;;  %4155 = vmatpush3.bf16.msra.mxu0 %v4693_v17  ;;  %v3693_v16 = vcombine.low %v5172_v2, %v5144_v46 }
  0x3e   : > { %4156 = vmatprep.subr.bf16.mxu0 %v4694_v18 }
  0x3f   : > { %vm5267_vm1 = vcmp.ne.s16.totalorder %v3693_v16, 0  ;;  %v4712_v16 = vld [vmem:[%s6138_s4 + $0x20] sm:$0xff]  }
  0x41   : > { %4157 = vmatpush3.bf16.msra.mxu0 %v4694_v18 }
  0x42   : > { %4158 = vmatprep.subr.bf16.mxu0 %v4696_v21 }
  0x44   : > { %4139 = vmatmul.mubr.bf16.gmra.mrb[8].mxu0 %v448_v19  ;;  %v5204_v19 = vsel %vm1318_vm11, 65537, %v4884_v45 }
  0x45   : > { %4142 = vmatprep.mubr.bf16.mxu0 %v450_v20  ;;  %4159 = vmatpush3.bf16.msra.mxu0 %v4696_v21  ;;  %v993_v21 = vand.u32 15, %v731_v4  ;;  %v3694_v41 = vcombine.low %v5204_v19, %v5144_v46 }
  0x46   : > { %4160 = vmatprep.subr.bf16.mxu0 %v4698_v22 }
  0x47   : > { %vm5238_vm15 = vcmp.ne.s32.totalorder %v993_v21, 0  ;;  %vm5330_vm6 = vcmp.ne.s16.totalorder %v3694_v41, 0 }
  0x48   : > { %vm1322_vm2 = vmpackc.low %vm5238_vm15, %vm5238_vm15 }
  0x49   : > { %4161 = vmatpush3.bf16.msra.mxu0 %v4698_v22 }
  0x4a   : > { %4162 = vmatprep.subr.bf16.mxu0 %v4700_v27 }
  0x4c   : > { %4143 = vmatmul.mubr.bf16.gmra.mrb[12].mxu0 %v452_v23 }
  0x4d   : > { %4146 = vmatprep.mubr.bf16.mxu0 %v454_v24  ;;  %4163 = vmatpush3.bf16.msra.mxu0 %v4700_v27 }
  0x4e   : > { %4164 = vmatprep.subr.bf16.mxu0 %v4702_v29 }
  0x51   : > { %4165 = vmatpush3.bf16.msra.mxu0 %v4702_v29 }
  0x52   : > { %4182 = vmatprep.subr.bf16.mxu0 %v5114_v31 }
  0x54   : > { %4147 = vmatmul.mubr.bf16.gmra.mrb[16].mxu0 %v4690_v25 }
 0x107   : > { %v4132_v44 = vpop.f32.mrb[0].mxu0 }
 0x108   : > { %v630_v50 = vadd.f32 %v4132_v44, %v5141_v43  ;;  %v621_v51 = vpop.f32.mrb[1].mxu0 }
 0x109   : > { %v622_v52 = vadd.f32 %v5141_v43, %v621_v51  ;;  %v4133_v54 = vpop.f32.mrb[2].mxu0 }
 0x10a   : > { %v633_v56 = vadd.f32 %v4133_v54, %v5141_v43  ;;  %v624_v57 = vpop.f32.mrb[3].mxu0  ;;  %v702_v62 = vmax.f32 %v630_v50, 0.0 }
 0x10b   : > { %v700_v59 = vmax.f32 %v622_v52, 0.0  ;;  %v625_v60 = vadd.f32 %v5141_v43, %v624_v57  ;;  %v1340_v52 = vsel %vm1320_vm14, 65537, %v4884_v45 }
 0x10c   : > { %v703_v0 = vmax.f32 %v633_v56, 0.0  ;;  %v4710_v56 = vld [vmem:[%s6138_s4 + $0x18] sm:$0xff]   ;;  %v3695_v4 = vcombine.low %v1340_v52, %v5144_v46 }
 0x10d   : > { %v701_v1 = vmax.f32 %v625_v60, 0.0  ;;  %v889_v7 = vsel %vm5164_vm7, %v700_v59, 0.0 }
 0x10e   : > { %v5175_v5 = vpack.c.bf16 %v703_v0, %v702_v62  ;;  %vm5347_vm11 = vcmp.ne.s16.totalorder %v3695_v4, 0 }
 0x10f   : > { %v890_v8 = vsel %vm5164_vm7, %v701_v1, 0.0  ;;  %v3720_v9 = vpack.c.bf16 %v701_v1, %v700_v59  ;;  %v4136_v10 = vpop.f32.mrb[4].mxu0  ;;  %v1007_v59 = vand.u32 15, %v733_v30  ;;  %vm1269_vm7 = vcmask 1040384  }
 0x110   : > { %v5188_v11 = vpack.c.bf16 %v890_v8, %v889_v7  ;;  %v646_v12 = vadd.f32 %v4136_v10, %v5141_v43  ;;  %v637_v13 = vpop.f32.mrb[5].mxu0  ;;  %v1188_v15 = vshrl.u32 %v5175_v5, 16  ;;  %v1191_v29 = vshll.u32 %v5175_v5, 16  ;;  %vm5423_vm15 = vmand %vm1269_vm7, %vm1179_vm9 }
 0x111   : > { %v638_v17 = vadd.f32 %v5141_v43, %v637_v13  ;;  %v4137_v18 = vpop.f32.mrb[6].mxu0  ;;  %4166 = vmatprep.mubr.msk.bf16.mxu0 %vm3719_vm8, %v3720_v9  ;;  %v1021_v7 = vand.u32 15, %v735_v47  ;;  %vm5304_vm4 = vcmp.ne.s32.totalorder %v1007_v59, 0 }
 0x112   : > { %v1181_v22 = vshrl.u32 %v5188_v11, 16  ;;  %v1184_v23 = vshll.u32 %v5188_v11, 16  ;;  %v649_v24 = vadd.f32 %v4137_v18, %v5141_v43  ;;  %v640_v25 = vpop.f32.mrb[7].mxu0  ;;  %4167 = vmatmul.mubr.bf16.vlgmr.msra.gmra.mrb[20].mxu0 %v5175_v5  ;;  %v5219_v28 = vrot.slane %v1188_v15, 7  ;;  %vm1324_vm8 = vmpackc.low %vm5304_vm4, %vm5304_vm4 }
 0x113   : > { %v641_v27 = vadd.f32 %v5141_v43, %v640_v25  ;;  %4183 = vmatpush3.bf16.msra.mxu0 %v5114_v31  ;;  %v706_v33 = vmax.f32 %v646_v12, 0.0  ;;  %v4708_v31 = vld [vmem:[%s6138_s4 + $0x10] sm:$0xff]   ;;  %v704_v38 = vmax.f32 %v638_v17, 0.0  ;;  %v5250_v53 = vrot.slane %v1191_v29, 1 }
 0x114   : > { %v1423_v32 = vrot.slane %v1184_v23, 1  ;;  %v707_v34 = vmax.f32 %v649_v24, 0.0  ;;  %4184 = vmatprep.subr.bf16.mxu0 %v4706_v14  ;;  %v5225_v36 = vrot.slane %v1181_v22, 7  ;;  %v1193_v40 = vor.u32 %v1191_v29, %v5219_v28 }
 0x115   : > { %v705_v39 = vmax.f32 %v641_v27, 0.0  ;;  %v5302_v17 = vsel %vm1322_vm2, 65537, %v4884_v45  ;;  %v5317_v25 = vsel %vm1312_vm3, 65537, %v4884_v45  ;;  %vm5319_vm5 = vcmp.ne.s32.totalorder %v1021_v7, 0 }
 0x116   : > { %v5236_v42 = vpack.c.bf16 %v707_v34, %v706_v33  ;;  %v1424_v48 = vor.u32 %v1423_v32, %v1181_v22  ;;  %v5247_v51 = vsel %vm1179_vm9, %v5225_v36, %v1193_v40  ;;  %v737_v27 = vadd.s32 128, %v5132_v37  ;;  %v4713_v34 = vld [vmem:[%s6138_s4 + $0x108] sm:$0xff]   ;;  %vm1326_vm13 = vmpackc.low %vm5319_vm5, %vm5319_vm5  ;;  %v4750_v33 = vld [vmem:[%s6138_s4 + $0x1d8] sm:$0xff]  }
 0x117   : > { %v5243_v49 = vpack.c.bf16 %v705_v39, %v704_v38  ;;  %v4140_v50 = vpop.f32.mrb[8].mxu0  ;;  %4185 = vmatpush3.bf16.msra.mxu0 %v4706_v14  ;;  %4262 = vmatprep.mubr.msk.bf16.mxu1 %vm5177_vm10, %v5247_v51  ;;  %v3696_v41 = vcombine.low %v5302_v17, %v5144_v46  ;;  %v5388_v58 = vsel %vm1324_vm8, 65537, %v4884_v45  ;;  %v4751_v39 = vld [vmem:[%s6138_s4 + $0x1e0] sm:$0xff]  }
 0x118   : > { %v662_v54 = vadd.f32 %v4140_v50, %v5141_v43  ;;  %v653_v55 = vpop.f32.mrb[9].mxu0  ;;  %4186 = vmatprep.subr.bf16.mxu0 %v4708_v31  ;;  %v1204_v57 = vshrl.u32 %v5236_v42, 16  ;;  %v5276_v0 = vsel %vm1422_vm12, %v1424_v48, %v5250_v53  ;;  %v1207_v12 = vshll.u32 %v5236_v42, 16  ;;  %v4715_v50 = vld [vmem:[%s6138_s4 + $0x110] sm:$0xff]  }
 0x119   : > { %v654_v60 = vadd.f32 %v5141_v43, %v653_v55  ;;  %v4141_v61 = vpop.f32.mrb[10].mxu0  ;;  %4170 = vmatprep.mubr.bf16.mxu0 %v5243_v49  ;;  %v1196_v62 = vshrl.u32 %v5243_v49, 16  ;;  %v1199_v10 = vshll.u32 %v5243_v49, 16  ;;  %v1035_v59 = vand.u32 15, %v737_v27 }
 0x11a   : > { %v665_v1 = vadd.f32 %v4141_v61, %v5141_v43  ;;  %v656_v2 = vpop.f32.mrb[11].mxu0  ;;  %4171 = vmatmul.mubr.bf16.gmra.mrb[24].mxu0 %v5236_v42  ;;  %v5282_v3 = vrot.slane %v1204_v57, 7  ;;  %v710_v13 = vmax.f32 %v662_v54, 0.0  ;;  %v3691_v54 = vcombine.low %v5317_v25, %v5144_v46 }
 0x11b   : > { %v657_v8 = vadd.f32 %v5141_v43, %v656_v2  ;;  %4187 = vmatpush3.bf16.msra.mxu0 %v4708_v31  ;;  %v1198_v9 = vrot.slane %v1196_v62, 7  ;;  %v708_v19 = vmax.f32 %v654_v60, 0.0  ;;  %vm5417_vm14 = vcmp.ne.s16.totalorder %v3696_v41, 0 }
 0x11c   : > { %v711_v14 = vmax.f32 %v665_v1, 0.0  ;;  %4188 = vmatprep.subr.bf16.mxu0 %v4710_v56  ;;  %v1209_v22 = vor.u32 %v1207_v12, %v5282_v3  ;;  %vm5433_vm0 = vcmp.ne.s16.totalorder %v3691_v54, 0  ;;  %vm5437_vm2 = vcmp.ne.s32.totalorder %v1035_v59, 0 }
 0x11d   : > { %v709_v20 = vmax.f32 %v657_v8, 0.0  ;;  %v1201_v21 = vor.u32 %v1199_v10, %v1198_v9  ;;  %v4716_v8 = vld [vmem:[%s6138_s4 + $0x30] sm:$0xff]   ;;  %vm1328_vm3 = vmpackc.low %vm5437_vm2, %vm5437_vm2 }
 0x11e   : > { %v5313_v24 = vpack.c.bf16 %v711_v14, %v710_v13  ;;  %v5358_v48 = vsel %vm1179_vm9, %v1198_v9, %v1209_v22  ;;  %v1186_v9 = vor.u32 %v1184_v23, %v5225_v36  ;;  %v5407_v13 = vsel %vm1326_vm13, 65537, %v4884_v45 }
 0x11f   : > { %v5324_v29 = vpack.c.bf16 %v709_v20, %v708_v19  ;;  %v4144_v30 = vpop.f32.mrb[12].mxu0  ;;  %4189 = vmatpush3.bf16.msra.mxu0 %v4710_v56  ;;  %v5328_v32 = vsel %vm1179_vm9, %v5219_v28, %v1201_v21  ;;  %v4714_v28 = vld [vmem:[%s6138_s4 + $0x28] sm:$0xff]   ;;  %v807_v23 = vstv %s5376_s11  ;;  %v1348_v19 = vsel %vm1328_vm3, 65537, %v4884_v45  ;;  %s4791_s11 = sshll.u32 %s4885_s10, 4  ;;  %s4792_s11 = int_to_ptr.vmem [resolvable:$false] %s4791_s11 }
 0x120   : > { %v678_v31 = vadd.f32 %v4144_v30, %v5141_v43  ;;  %v669_v38 = vpop.f32.mrb[13].mxu0  ;;  %4263 = vmatmul.mubr.msk.bf16.vlgmr.msra.gmra.mrb[0].mxu1 %vm5267_vm1, %v5328_v32  ;;  %4190 = vmatprep.subr.bf16.mxu0 %v4712_v16  ;;  %v1220_v40 = vshrl.u32 %v5313_v24, 16  ;;  %v1223_v2 = vshll.u32 %v5313_v24, 16  ;;  %v1271_v54 = vsel %vm5423_vm15, 0, %v1186_v9  ;;  %s4793_s16 = scalar_lea.vmem %s4792_s11, 2048  ;;  %p4794_p10 = scmp.lt.s32.totalorder %s6076_s28, %s4792_s11 }
 0x121   : > { %v670_v44 = vadd.f32 %v5141_v43, %v669_v38  ;;  %4279 = vmatpush3.bf16.msra.mxu1 %v5129_v35  ;;  %v4145_v47 = vpop.f32.mrb[14].mxu0  ;;  %4174 = vmatprep.mubr.bf16.mxu0 %v5324_v29  ;;  %v1212_v52 = vshrl.u32 %v5324_v29, 16  ;;  %v1215_v1 = vshll.u32 %v5324_v29, 16  ;;  %vm5480_vm4 = vcmp.eq.s32.totalorder %v807_v23, 1  ;;  %p4795_p11 = scmp.lt.s32.totalorder %s4793_s16, %s4787_s30 }
 0x122   : > { %v681_v35 = vadd.f32 %v4145_v47, %v5141_v43  ;;  %4266 = vmatprep.mubr.msk.bf16.mxu1 %vm5330_vm6, %v5358_v48  ;;  %v672_v55 = vpop.f32.mrb[15].mxu0  ;;  %4175 = vmatmul.mubr.bf16.gmra.mrb[28].mxu0 %v5313_v24  ;;  %v5380_v56 = vrot.slane %v1220_v40, 7  ;;  %v714_v4 = vmax.f32 %v678_v31, 0.0  ;;  %v3697_v31 = vcombine.low %v5388_v58, %v5144_v46 }
 0x123   : > { %v673_v60 = vadd.f32 %v5141_v43, %v672_v55  ;;  %4191 = vmatpush3.bf16.msra.mxu0 %v4712_v16  ;;  %4280 = vmatprep.subr.bf16.mxu1 %v4713_v34  ;;  %v1214_v61 = vrot.slane %v1212_v52, 7  ;;  %v712_v14 = vmax.f32 %v670_v44, 0.0  ;;  %p4796_p12 = por %p4795_p11, %p4794_p10 }
 0x124   : > { %v715_v7 = vmax.f32 %v681_v35, 0.0  ;;  %4192 = vmatprep.subr.bf16.mxu0 %v4714_v28  ;;  %v1225_v18 = vor.u32 %v1223_v2, %v5380_v56  ;;  %vm5490_vm5 = vcmp.ne.s16.totalorder %v3697_v31, 0 }
 0x125   : > { %v713_v16 = vmax.f32 %v673_v60, 0.0  ;;  %4281 = vmatpush3.bf16.msra.mxu1 %v4713_v34  ;;  %v1217_v17 = vor.u32 %v1215_v1, %v1214_v61  ;;  %v4718_v34 = vld [vmem:[%s6138_s4 + $0x38] sm:$0xff]   ;;  %p4797_p13 = pnand %p4796_p12, %p4790_p9 }
 0x126   : > { %v5414_v11 = vpack.c.bf16 %v715_v7, %v714_v4  ;;  %4282 = vmatprep.subr.bf16.mxu1 %v4715_v50  ;;  %v5459_v47 = vsel %vm1179_vm9, %v1214_v61, %v1225_v18  ;;  %v4763_v4 = vld [vmem:[%s6139_s5] sm:$0xff]  }
 0x127   : > { %v5427_v20 = vpack.c.bf16 %v713_v16, %v712_v14  ;;  %v4148_v21 = vpop.f32.mrb[16].mxu0  ;;  %4193 = vmatpush3.bf16.msra.mxu0 %v4714_v28  ;;  %v5431_v22 = vsel %vm1179_vm9, %v5282_v3, %v1217_v17  ;;  %v4717_v3 = vld [vmem:[%s6138_s4 + $0x118] sm:$0xff]   ;;  %v3698_v28 = vcombine.low %v5407_v13, %v5144_v46 }
 0x128   : > { %v694_v27 = vadd.f32 %v4148_v21, %v5141_v43  ;;  %v685_v30 = vpop.f32.mrb[17].mxu0  ;;  %4267 = vmatmul.mubr.msk.bf16.gmra.mrb[4].mxu1 %vm5347_vm11, %v5431_v22  ;;  %4194 = vmatprep.subr.bf16.mxu0 %v4716_v8  ;;  %v1236_v38 = vshrl.u32 %v5414_v11, 16  ;;  %v1239_v61 = vshll.u32 %v5414_v11, 16  ;;  %v4754_v16 = vld [vmem:[%s6138_s4 + $0x1f8] sm:$0xff]  }
 0x129   : > { %v686_v41 = vadd.f32 %v5141_v43, %v685_v30  ;;  %4283 = vmatpush3.bf16.msra.mxu1 %v4715_v50  ;;  %v4149_v44 = vpop.f32.mrb[18].mxu0  ;;  %4178 = vmatprep.mubr.bf16.mxu0 %v5427_v20  ;;  %v1228_v35 = vshrl.u32 %v5427_v20, 16  ;;  %v4719_v50 = vld [vmem:[%s6138_s4 + $0x120] sm:$0xff]   ;;  %v1231_v13 = vshll.u32 %v5427_v20, 16  ;;  %vm5514_vm7 = vcmp.ne.s16.totalorder %v3698_v28, 0 }
 0x12a   : > { %v718_v55 = vmax.f32 %v694_v27, 0.0  ;;  %v697_v58 = vadd.f32 %v4149_v44, %v5141_v43  ;;  %4270 = vmatprep.mubr.msk.bf16.mxu1 %vm5417_vm14, %v5459_v47  ;;  %v688_v59 = vpop.f32.mrb[19].mxu0  ;;  %4179 = vmatmul.mubr.bf16.gmra.mrb[32].mxu0 %v5414_v11  ;;  %v5474_v60 = vrot.slane %v1236_v38, 7  ;;  %v4722_v44 = vld [vmem:[%s6138_s4 + $0x88] sm:$0xff]   ;;  %v4755_v30 = vld [vmem:[%s6138_s4 + $0x200] sm:$0xff]  }
 0x12b   : > { %v689_v7 = vadd.f32 %v5141_v43, %v688_v59  ;;  %4195 = vmatpush3.bf16.msra.mxu0 %v4716_v8  ;;  %4198 = vmatprep.mubr.msk.bf16.mxu0 %vm5433_vm0, %v1271_v54  ;;  %v1230_v9 = vrot.slane %v1228_v35, 7  ;;  %v4720_v8 = vld [vmem:[%s6138_s4 + $0x80] sm:$0xff]   ;;  %v716_v17 = vmax.f32 %v686_v41, 0.0  ;;  %v3699_v54 = vcombine.low %v1348_v19, %v5144_v46  ;;  %v4723_v59 = vld [vmem:[%s6138_s4 + $0x130] sm:$0xff]  }
 0x12c   : > { %v719_v14 = vmax.f32 %v697_v58, 0.0  ;;  %4284 = vmatprep.subr.bf16.mxu1 %v4717_v3  ;;  %4196 = vmatprep.subr.bf16.mxu0 %v4718_v34  ;;  %v1241_v43 = vor.u32 %v1239_v61, %v5474_v60  ;;  %v907_v21 = vsel %vm5480_vm4, %v718_v55, 0.0 }
 0x12d   : > { %v717_v18 = vmax.f32 %v689_v7, 0.0  ;;  %4285 = vmatpush3.bf16.msra.mxu1 %v4717_v3  ;;  %v1233_v23 = vor.u32 %v1231_v13, %v1230_v9  ;;  %v4721_v3 = vld [vmem:[%s6138_s4 + $0x128] sm:$0xff]   ;;  %v722_v7 = vadd.s32 8, %v5132_v37 }
 0x12e   : > { %v908_v25 = vsel %vm5480_vm4, %v719_v14, 0.0  ;;  %v5512_v27 = vpack.c.bf16 %v719_v14, %v718_v55  ;;  %4286 = vmatprep.subr.bf16.mxu1 %v4719_v50  ;;  %v5531_v28 = vsel %vm1179_vm9, %v1230_v9, %v1241_v43 }
 0x12f   : > { %v918_v26 = vpack.c.bf16 %v908_v25, %v907_v21  ;;  %v5521_v31 = vpack.c.bf16 %v717_v18, %v716_v17  ;;  %4197 = vmatpush3.bf16.msra.mxu0 %v4718_v34  ;;  %v5525_v41 = vsel %vm1179_vm9, %v5380_v56, %v1233_v23  ;;  %v930_v25 = vand.u32 15, %v722_v7  ;;  %v4766_v17 = vld [vmem:[%s6139_s5 + $0x18] sm:$0xff]  }
 0x130   : > { %4271 = vmatmul.mubr.msk.bf16.gmra.mrb[8].mxu1 %vm5490_vm5, %v5525_v41  ;;  %4214 = vmatprep.subr.bf16.mxu0 %v4720_v8 }
 0x131   : > { %v1252_v55 = vshrl.u32 %v918_v26, 16  ;;  %v1255_v34 = vshll.u32 %v918_v26, 16  ;;  %v1244_v58 = vshrl.u32 %v5521_v31, 16  ;;  %4287 = vmatpush3.bf16.msra.mxu1 %v4719_v50  ;;  %4274 = vmatprep.mubr.msk.bf16.mxu1 %vm5514_vm7, %v5531_v28  ;;  %v1247_v56 = vshll.u32 %v5521_v31, 16 }
 0x132   : > { %4199 = vmatmul.mubr.msk.bf16.vlgmr.msra.gmra.mrb[20].mxu0 %vm5177_vm10, %v5247_v51  ;;  %4288 = vmatprep.subr.bf16.mxu1 %v4721_v3  ;;  %vm5557_vm10 = vcmp.ne.s16.totalorder %v3699_v54, 0  ;;  %v724_v54 = vadd.s32 24, %v5132_v37 }
 0x133   : > { %v1254_v9 = vrot.slane %v1252_v55, 7  ;;  %4202 = vmatprep.mubr.msk.bf16.mxu0 %vm5267_vm1, %v5328_v32  ;;  %4215 = vmatpush3.bf16.msra.mxu0 %v4720_v8  ;;  %v1246_v50 = vrot.slane %v1244_v58, 7  ;;  %v5552_v14 = vrot.slane %v1247_v56, 1  ;;  %v1449_v43 = vrot.slane %v1255_v34, 1  ;;  %v4725_v8 = vld [vmem:[%s6138_s4 + $0x138] sm:$0xff]  }
 0x134   : > { %4216 = vmatprep.subr.bf16.mxu0 %v4722_v44 }
 0x135   : > { %4289 = vmatpush3.bf16.msra.mxu1 %v4721_v3  ;;  %v1249_v51 = vor.u32 %v1247_v56, %v1246_v50  ;;  %v1448_v18 = vor.u32 %v5552_v14, %v1244_v58  ;;  %v1257_v23 = vor.u32 %v1255_v34, %v1254_v9  ;;  %v5565_v19 = vor.u32 %v1449_v43, %v1252_v55  ;;  %v4728_v58 = vld [vmem:[%s6138_s4 + $0xa0] sm:$0xff]   ;;  %v4729_v56 = vld [vmem:[%s6138_s4 + $0x148] sm:$0xff]   ;;  %v4734_v55 = vld [vmem:[%s6138_s4 + $0xb8] sm:$0xff]  }
 0x136   : > { %4290 = vmatprep.subr.bf16.mxu1 %v4723_v59  ;;  %v726_v34 = vadd.s32 40, %v5132_v37  ;;  %v4730_v9 = vld [vmem:[%s6138_s4 + $0xa8] sm:$0xff]  }
 0x137   : > { %4217 = vmatpush3.bf16.msra.mxu0 %v4722_v44  ;;  %v5569_v21 = vsel %vm1179_vm9, %v5474_v60, %v1249_v51  ;;  %v5572_v3 = vsel %vm1422_vm12, %v1448_v18, %v1449_v43  ;;  %v5575_v26 = vsel %vm1179_vm9, %v1246_v50, %v1257_v23  ;;  %v4726_v44 = vld [vmem:[%s6138_s4 + $0x98] sm:$0xff]   ;;  %v4727_v60 = vld [vmem:[%s6138_s4 + $0x140] sm:$0xff]   ;;  %vm5594_vm9 = vcmp.ne.s32.totalorder %v930_v25, 15  ;;  %v4731_v43 = vld [vmem:[%s6138_s4 + $0x150] sm:$0xff]  }
 0x138   : > { %4275 = vmatmul.mubr.msk.bf16.gmra.mrb[12].mxu1 %vm5557_vm10, %v5569_v21  ;;  %4218 = vmatprep.subr.bf16.mxu0 %v4724_v6  ;;  %vm1506_vm8 = vmpackc.low %vm5594_vm9, %vm5594_vm9  ;;  %v958_v7 = vand.u32 15, %v726_v34  ;;  %v728_v51 = vadd.s32 56, %v5132_v37  ;;  %v730_v23 = vadd.s32 72, %v5132_v37 }
 0x139   : > { %4291 = vmatpush3.bf16.msra.mxu1 %v4723_v59  ;;  %4294 = vmatprep.mubr.bf16.mxu1 %v5175_v5  ;;  %v944_v59 = vand.u32 15, %v724_v54  ;;  %v1526_v50 = vsel %vm1506_vm8, 65537, %v4884_v45 }
 0x13a   : > { %4203 = vmatmul.mubr.msk.bf16.gmra.mrb[24].mxu0 %vm5330_vm6, %v5358_v48  ;;  %4292 = vmatprep.subr.bf16.mxu1 %v4725_v8  ;;  %vm5628_vm15 = vcmp.ne.s32.totalorder %v958_v7, 15  ;;  %v3701_v25 = vcombine.low %v5144_v46, %v1526_v50  ;;  %v986_v54 = vand.u32 15, %v730_v23  ;;  %v1427_v23 = vor.u32 %v5250_v53, %v1188_v15  ;;  %v4738_v7 = vld [vmem:[%s6138_s4 + $0x178] sm:$0xff]  }
 0x13b   : > { %4206 = vmatprep.mubr.msk.bf16.mxu0 %vm5347_vm11, %v5431_v22  ;;  %4219 = vmatpush3.bf16.msra.mxu0 %v4724_v6  ;;  %vm5620_vm13 = vcmp.ne.s32.totalorder %v944_v59, 15  ;;  %vm1510_vm2 = vmpackc.low %vm5628_vm15, %vm5628_vm15  ;;  %v4735_v59 = vld [vmem:[%s6138_s4 + $0x160] sm:$0xff]  }
 0x13c   : > { %4220 = vmatprep.subr.bf16.mxu0 %v4726_v44  ;;  %vm1508_vm0 = vmpackc.low %vm5620_vm13, %vm5620_vm13  ;;  %vm1575_vm3 = vcmp.ne.s16.totalorder %v3701_v25, 0  ;;  %vm5668_vm8 = vcmp.ne.s32.totalorder %v986_v54, 15  ;;  %v1434_v54 = vrot.slane %v1215_v1, 1 }
 0x13d   : > { %4293 = vmatpush3.bf16.msra.mxu1 %v4725_v8  ;;  %v4732_v8 = vld [vmem:[%s6138_s4 + $0xb0] sm:$0xff]   ;;  %v1528_v34 = vsel %vm1508_vm0, 65537, %v4884_v45  ;;  %vm1514_vm15 = vmpackc.low %vm5668_vm8, %vm5668_vm8 }
 0x13e   : > { %4310 = vmatprep.subr.bf16.mxu1 %v4727_v60  ;;  %v1534_v15 = vsel %vm1514_vm15, 65537, %v4884_v45  ;;  %v1436_v1 = vor.u32 %v1434_v54, %v1212_v52  ;;  %v1437_v52 = vrot.slane %v1223_v2, 1 }
 0x13f   : > { %4221 = vmatpush3.bf16.msra.mxu0 %v4726_v44  ;;  %v4733_v44 = vld [vmem:[%s6138_s4 + $0x158] sm:$0xff]  }
 0x140   : > { %4295 = vmatmul.mubr.bf16.vlgmr.msra.gmra.mrb[0].mxu1 %v5243_v49  ;;  %4222 = vmatprep.subr.bf16.mxu0 %v4728_v58  ;;  %v5762_v2 = vsel %vm1422_vm12, %v1436_v1, %v1437_v52 }
 0x141   : > { %4311 = vmatpush3.bf16.msra.mxu1 %v4727_v60  ;;  %4298 = vmatprep.mubr.bf16.mxu1 %v5236_v42  ;;  %v972_v60 = vand.u32 15, %v728_v51  ;;  %v4736_v51 = vld [vmem:[%s6138_s4 + $0x168] sm:$0xff]  }
 0x142   : > { %4207 = vmatmul.mubr.msk.bf16.gmra.mrb[28].mxu0 %vm5417_vm14, %v5459_v47  ;;  %4312 = vmatprep.subr.bf16.mxu1 %v4729_v56 }
 0x143   : > { %4210 = vmatprep.mubr.msk.bf16.mxu0 %vm5490_vm5, %v5525_v41  ;;  %4223 = vmatpush3.bf16.msra.mxu0 %v4728_v58  ;;  %v1530_v58 = vsel %vm1510_vm2, 65537, %v4884_v45  ;;  %vm5661_vm9 = vcmp.ne.s32.totalorder %v972_v60, 15 }
 0x144   : > { %4224 = vmatprep.subr.bf16.mxu0 %v4730_v9  ;;  %v3703_v6 = vcombine.low %v5144_v46, %v1530_v58  ;;  %vm1512_vm13 = vmpackc.low %vm5661_vm9, %vm5661_vm9 }
 0x145   : > { %4313 = vmatpush3.bf16.msra.mxu1 %v4729_v56  ;;  %v1428_v56 = vrot.slane %v1199_v10, 1  ;;  %v3702_v10 = vcombine.low %v5144_v46, %v1528_v34  ;;  %v1532_v60 = vsel %vm1512_vm13, 65537, %v4884_v45  ;;  %v736_v34 = vadd.s32 120, %v5132_v37 }
 0x146   : > { %4314 = vmatprep.subr.bf16.mxu1 %v4731_v43  ;;  %vm5695_vm2 = vcmp.ne.s16.totalorder %v3703_v6, 0  ;;  %v3704_v58 = vcombine.low %v5144_v46, %v1532_v60 }
 0x147   : > { %4225 = vmatpush3.bf16.msra.mxu0 %v4730_v9  ;;  %v732_v9 = vadd.s32 88, %v5132_v37  ;;  %vm5688_vm0 = vcmp.ne.s16.totalorder %v3702_v10, 0  ;;  %v1429_v5 = vsel %vm1422_vm12, %v1427_v23, %v1428_v56 }
 0x148   : > { %4299 = vmatmul.mubr.bf16.gmra.mrb[4].mxu1 %v5324_v29  ;;  %4226 = vmatprep.subr.bf16.mxu0 %v4732_v8  ;;  %vm5740_vm15 = vcmp.ne.s16.totalorder %v3704_v58, 0  ;;  %v4742_v58 = vld [vmem:[%s6138_s4 + $0x198] sm:$0xff]  }
 0x149   : > { %4315 = vmatpush3.bf16.msra.mxu1 %v4731_v43  ;;  %4302 = vmatprep.mubr.bf16.mxu1 %v5313_v24  ;;  %v734_v43 = vadd.s32 104, %v5132_v37  ;;  %v1000_v18 = vand.u32 15, %v732_v9  ;;  %v1028_v9 = vand.u32 15, %v736_v34 }
 0x14a   : > { %4211 = vmatmul.mubr.msk.bf16.gmra.mrb[32].mxu0 %vm5514_vm7, %v5531_v28  ;;  %4316 = vmatprep.subr.bf16.mxu1 %v4733_v44 }
 0x14b   : > { %4227 = vmatpush3.bf16.msra.mxu0 %v4732_v8  ;;  %4230 = vmatprep.mubr.msk.bf16.mxu0 %vm1575_vm3, %v5276_v0  ;;  %v1430_v0 = vor.u32 %v1428_v56, %v1196_v62  ;;  %v1014_v25 = vand.u32 15, %v734_v43  ;;  %v1431_v62 = vrot.slane %v1207_v12, 1  ;;  %v4737_v12 = vld [vmem:[%s6138_s4 + $0x170] sm:$0xff]   ;;  %vm5713_vm3 = vcmp.ne.s32.totalorder %v1000_v18, 15 }
 0x14c   : > { %4228 = vmatprep.subr.bf16.mxu0 %v4734_v55  ;;  %vm1516_vm8 = vmpackc.low %vm5713_vm3, %vm5713_vm3  ;;  %v6215_v43 = vmov 0  ;;  %v1440_v18 = vrot.slane %v1231_v13, 1  ;;  %v1439_v13 = vor.u32 %v1437_v52, %v1220_v40 }
 0x14d   : > { %4317 = vmatpush3.bf16.msra.mxu1 %v4733_v44  ;;  %v5706_v53 = vsel %vm1422_vm12, %v1430_v0, %v1431_v62  ;;  %vm5722_vm9 = vcmp.ne.s32.totalorder %v1014_v25, 15  ;;  %v1433_v10 = vor.u32 %v1431_v62, %v1204_v57  ;;  %v1536_v6 = vsel %vm1516_vm8, 65537, %v4884_v45  ;;  %v4740_v62 = vld [vmem:[%s6138_s4 + $0x188] sm:$0xff]  }
 0x14e   : > { %4318 = vmatprep.subr.bf16.mxu1 %v4735_v59  ;;  %vm1518_vm13 = vmpackc.low %vm5722_vm9, %vm5722_vm9  ;;  %v3706_v23 = vcombine.low %v5144_v46, %v1536_v6  ;;  %v1442_v25 = vor.u32 %v1440_v18, %v1228_v35  ;;  %v5800_v40 = vsel %vm1422_vm12, %v1439_v13, %v1440_v18  ;;  %v4746_v6 = vld [vmem:[%s6138_s4 + $0x1b8] sm:$0xff]   ;;  %v739_v18 = vadd.s32 144, %v5132_v37 }
 0x14f   : > { %4229 = vmatpush3.bf16.msra.mxu0 %v4734_v55  ;;  %v5755_v57 = vsel %vm1422_vm12, %v1433_v10, %v1434_v54  ;;  %v1538_v0 = vsel %vm1518_vm13, 65537, %v4884_v45  ;;  %v4741_v54 = vld [vmem:[%s6138_s4 + $0x190] sm:$0xff]  }
 0x150   : > { %4303 = vmatmul.mubr.bf16.gmra.mrb[8].mxu1 %v5427_v20  ;;  %v3707_v8 = vcombine.low %v5144_v46, %v1538_v0  ;;  %vm5781_vm8 = vcmp.ne.s16.totalorder %v3706_v23, 0  ;;  %v4745_v10 = vld [vmem:[%s6138_s4 + $0x1b0] sm:$0xff]   ;;  %v4747_v0 = vld [vmem:[%s6138_s4 + $0x1c0] sm:$0xff]   ;;  %4438 = vmatprep.subr.bf16.mxu0 %v4763_v4 }
 0x151   : > { %4319 = vmatpush3.bf16.msra.mxu1 %v4735_v59  ;;  %4306 = vmatprep.mubr.bf16.mxu1 %v5414_v11  ;;  %v3705_v59 = vcombine.low %v5144_v46, %v1534_v15 }
 0x152   : > { %4231 = vmatmul.mubr.msk.bf16.vlgmr.msra.gmra.mrb[20].mxu0 %vm5688_vm0, %v1429_v5  ;;  %4320 = vmatprep.subr.bf16.mxu1 %v4736_v51  ;;  %vm5790_vm13 = vcmp.ne.s16.totalorder %v3707_v8, 0 }
 0x153   : > { %4234 = vmatprep.mubr.msk.bf16.mxu0 %vm5695_vm2, %v5706_v53  ;;  %vm5747_vm3 = vcmp.ne.s16.totalorder %v3705_v59, 0  ;;  %4439 = vmatpush3.bf16.msra.mxu0 %v4763_v4 }
 0x154   : > { %v6216_v43 = vsel %vm5747_vm3, 4294967295, %v6215_v43 }
 0x155   : > { %4321 = vmatpush3.bf16.msra.mxu1 %v4736_v51  ;;  %v4739_v51 = vld [vmem:[%s6138_s4 + $0x180] sm:$0xff]  }
 0x156   : > { %4322 = vmatprep.subr.bf16.mxu1 %v4737_v12 }
 0x158   : > { %4307 = vmatmul.mubr.bf16.gmra.mrb[12].mxu1 %v5521_v31 }
 0x159   : > { %4323 = vmatpush3.bf16.msra.mxu1 %v4737_v12  ;;  %4326 = vmatprep.mubr.msk.bf16.mxu1 %vm5688_vm0, %v1429_v5  ;;  %vm1417_vm0 = vcmp.ne.s32.totalorder %v1028_v9, 15  ;;  %v1443_v5 = vrot.slane %v1239_v61, 1  ;;  %v738_v12 = vadd.s32 136, %v5132_v37 }
 0x15a   : > { %4235 = vmatmul.mubr.msk.bf16.gmra.mrb[24].mxu0 %vm5740_vm15, %v5755_v57  ;;  %4324 = vmatprep.subr.bf16.mxu1 %v4738_v7  ;;  %vm1520_vm9 = vmpackc.low %vm1417_vm0, %vm1417_vm0 }
 0x15b   : > { %4238 = vmatprep.mubr.msk.bf16.mxu0 %vm5747_vm3, %v5762_v2  ;;  %v1540_v15 = vsel %vm1520_vm9, 65537, %v4884_v45  ;;  %v5806_v61 = vsel %vm1422_vm12, %v1442_v25, %v1443_v5  ;;  %v1042_v34 = vand.u32 15, %v738_v12  ;;  %v1445_v56 = vor.u32 %v1443_v5, %v1236_v38  ;;  %v4743_v38 = vld [vmem:[%s6138_s4 + $0x1a0] sm:$0xff]  }
 0x15c   : > { %v3708_v55 = vcombine.low %v5144_v46, %v1540_v15 }
 0x15d   : > { %4325 = vmatpush3.bf16.msra.mxu1 %v4738_v7  ;;  %vm1419_vm9 = vcmp.ne.s32.totalorder %v1042_v34, 15  ;;  %v5832_v1 = vsel %vm1422_vm12, %v1445_v56, %v5552_v14  ;;  %v4744_v7 = vld [vmem:[%s6138_s4 + $0x1a8] sm:$0xff]  }
 0x15e   : > { %4342 = vmatprep.subr.bf16.mxu1 %v4739_v51  ;;  %vm5820_vm0 = vcmp.ne.s16.totalorder %v3708_v55, 0 }
 0x160   : > { %4327 = vmatmul.mubr.msk.bf16.vlgmr.msra.gmra.mrb[0].mxu1 %vm5695_vm2, %v5706_v53 }
 0x161   : > { %4343 = vmatpush3.bf16.msra.mxu1 %v4739_v51  ;;  %4330 = vmatprep.mubr.msk.bf16.mxu1 %vm5740_vm15, %v5755_v57  ;;  %v4748_v51 = vld [vmem:[%s6138_s4 + $0x1c8] sm:$0xff]  }
 0x162   : > { %4239 = vmatmul.mubr.msk.bf16.gmra.mrb[28].mxu0 %vm5781_vm8, %v5800_v40  ;;  %4344 = vmatprep.subr.bf16.mxu1 %v4740_v62 }
 0x163   : > { %4242 = vmatprep.mubr.msk.bf16.mxu0 %vm5790_vm13, %v5806_v61 }
 0x165   : > { %4345 = vmatpush3.bf16.msra.mxu1 %v4740_v62 }
 0x166   : > { %4346 = vmatprep.subr.bf16.mxu1 %v4741_v54 }
 0x168   : > { %4331 = vmatmul.mubr.msk.bf16.gmra.mrb[4].mxu1 %vm5747_vm3, %v5762_v2  ;;  %vm1522_vm3 = vmpackc.low %vm1419_vm9, %vm1419_vm9 }
 0x169   : > { %4347 = vmatpush3.bf16.msra.mxu1 %v4741_v54  ;;  %4334 = vmatprep.mubr.msk.bf16.mxu1 %vm5781_vm8, %v5800_v40  ;;  %v1542_v9 = vsel %vm1522_vm3, 65537, %v4884_v45  ;;  %v6007_v54 = vld [vmem:[%s6140_s6 + $0x1] ss:$0 sm:$0xff] }
 0x16a   : > { %4243 = vmatmul.mubr.msk.bf16.gmra.mrb[32].mxu0 %vm5820_vm0, %v5832_v1  ;;  %4348 = vmatprep.subr.bf16.mxu1 %v4742_v58  ;;  %v3709_v14 = vcombine.low %v5144_v46, %v1542_v9 }
 0x16c   : > { %vm5854_vm9 = vcmp.ne.s16.totalorder %v3709_v14, 0 }
 0x16d   : > { %4349 = vmatpush3.bf16.msra.mxu1 %v4742_v58 }
 0x16e   : > { %4350 = vmatprep.subr.bf16.mxu1 %v4743_v38 }
 0x170   : > { %4335 = vmatmul.mubr.msk.bf16.gmra.mrb[8].mxu1 %vm5790_vm13, %v5806_v61 }
 0x171   : > { %4351 = vmatpush3.bf16.msra.mxu1 %v4743_v38  ;;  %4338 = vmatprep.mubr.msk.bf16.mxu1 %vm5820_vm0, %v5832_v1 }
 0x172   : > { %4352 = vmatprep.subr.bf16.mxu1 %v4744_v7 }
 0x175   : > { %4353 = vmatpush3.bf16.msra.mxu1 %v4744_v7 }
 0x176   : > { %4354 = vmatprep.subr.bf16.mxu1 %v4745_v10 }
 0x178   : > { %4339 = vmatmul.mubr.msk.bf16.gmra.mrb[12].mxu1 %vm5854_vm9, %v5572_v3 }
 0x179   : > { %4355 = vmatpush3.bf16.msra.mxu1 %v4745_v10  ;;  %4358 = vmatprep.mubr.msk.bf16.mxu1 %vm5267_vm1, %v5328_v32  ;;  %v1049_v32 = vand.u32 15, %v739_v18 }
 0x17a   : > { %4356 = vmatprep.subr.bf16.mxu1 %v4746_v6 }
 0x17b   : > { %vm1177_vm1 = vcmp.ne.s32.totalorder %v1049_v32, 0 }
 0x17d   : > { %4357 = vmatpush3.bf16.msra.mxu1 %v4746_v6 }
 0x17e   : > { %4374 = vmatprep.subr.bf16.mxu1 %v4747_v0 }
 0x180   : > { %4359 = vmatmul.mubr.msk.bf16.vlgmr.msra.gmra.mrb[0].mxu1 %vm5330_vm6, %v5358_v48  ;;  %vm1330_vm6 = vmpackc.low %vm1177_vm1, %vm1177_vm1  ;;  %v4752_v48 = vld [vmem:[%s6138_s4 + $0x1e8] sm:$0xff]  }
 0x181   : > { %4375 = vmatpush3.bf16.msra.mxu1 %v4747_v0  ;;  %4362 = vmatprep.mubr.msk.bf16.mxu1 %vm5347_vm11, %v5431_v22  ;;  %v1350_v36 = vsel %vm1330_vm6, 65537, %v4884_v45 }
 0x182   : > { %4376 = vmatprep.subr.bf16.mxu1 %v4748_v51  ;;  %v3700_v22 = vcombine.low %v1350_v36, %v5144_v46 }
 0x184   : > { %vm1391_vm11 = vcmp.ne.s16.totalorder %v3700_v22, 0 }
 0x185   : > { %4377 = vmatpush3.bf16.msra.mxu1 %v4748_v51 }
 0x186   : > { %4378 = vmatprep.subr.bf16.mxu1 %v4749_v63 }
 0x188   : > { %4363 = vmatmul.mubr.msk.bf16.gmra.mrb[4].mxu1 %vm5417_vm14, %v5459_v47  ;;  %v4753_v47 = vld [vmem:[%s6138_s4 + $0x1f0] sm:$0xff]   ;;  %vm3818_vm14 = vmpackc.low %vm5480_vm4, %vm5480_vm4  ;;  %vm6225_vm4 = vnez %v6216_v43 }
 0x189   : > { %4379 = vmatpush3.bf16.msra.mxu1 %v4749_v63  ;;  %4366 = vmatprep.mubr.msk.bf16.mxu1 %vm5490_vm5, %v5525_v41  ;;  %v4756_v41 = vld [vmem:[%s6138_s4 + $0x208] sm:$0xff]  }
 0x18a   : > { %4380 = vmatprep.subr.bf16.mxu1 %v4750_v33 }
 0x18d   : > { %4381 = vmatpush3.bf16.msra.mxu1 %v4750_v33 }
 0x18e   : > { %4382 = vmatprep.subr.bf16.mxu1 %v4751_v39 }
 0x190   : > { %4367 = vmatmul.mubr.msk.bf16.gmra.mrb[8].mxu1 %vm5514_vm7, %v5531_v28  ;;  %v4758_v28 = vld [vmem:[%s6138_s4 + $0x218] sm:$0xff]  }
 0x191   : > { %4383 = vmatpush3.bf16.msra.mxu1 %v4751_v39  ;;  %4370 = vmatprep.mubr.msk.bf16.mxu1 %vm5557_vm10, %v5569_v21  ;;  %v4767_v21 = vld [vmem:[%s6139_s5 + $0x20] sm:$0xff]   ;;  %vm1462_vm10 = vcmask 1047552  }
 0x192   : > { %4384 = vmatprep.subr.bf16.mxu1 %v4752_v48 }
 0x195   : > { %4385 = vmatpush3.bf16.msra.mxu1 %v4752_v48 }
 0x196   : > { %4386 = vmatprep.subr.bf16.mxu1 %v4753_v47 }
 0x198   : > { %4371 = vmatmul.mubr.msk.bf16.gmra.mrb[12].mxu1 %vm1391_vm11, %v5575_v26 }
 0x199   : > { %4387 = vmatpush3.bf16.msra.mxu1 %v4753_v47  ;;  %4390 = vmatprep.mubr.bf16.mxu1 %v5243_v49  ;;  %v4757_v49 = vld [vmem:[%s6138_s4 + $0x210] sm:$0xff]  }
 0x19a   : > { %4388 = vmatprep.subr.bf16.mxu1 %v4754_v16 }
 0x19d   : > { %4389 = vmatpush3.bf16.msra.mxu1 %v4754_v16 }
 0x19e   : > { %4406 = vmatprep.subr.bf16.mxu1 %v4755_v30 }
 0x1a0   : > { %4391 = vmatmul.mubr.bf16.vlgmr.msra.gmra.mrb[0].mxu1 %v5236_v42  ;;  %v4759_v42 = vld [vmem:[%s6138_s4 + $0x220] sm:$0xff]  }
 0x1a1   : > { %4407 = vmatpush3.bf16.msra.mxu1 %v4755_v30  ;;  %4394 = vmatprep.mubr.bf16.mxu1 %v5324_v29  ;;  %v4760_v29 = vld [vmem:[%s6138_s4 + $0x228] sm:$0xff]  }
 0x1a2   : > { %4408 = vmatprep.subr.bf16.mxu1 %v4756_v41 }
 0x1a5   : > { %4409 = vmatpush3.bf16.msra.mxu1 %v4756_v41 }
 0x1a6   : > { %4410 = vmatprep.subr.bf16.mxu1 %v4757_v49 }
 0x1a8   : > { %4395 = vmatmul.mubr.bf16.gmra.mrb[4].mxu1 %v5313_v24  ;;  %v4761_v24 = vld [vmem:[%s6138_s4 + $0x230] sm:$0xff]  }
 0x1a9   : > { %4411 = vmatpush3.bf16.msra.mxu1 %v4757_v49  ;;  %4398 = vmatprep.mubr.bf16.mxu1 %v5427_v20  ;;  %v4762_v20 = vld [vmem:[%s6138_s4 + $0x238] sm:$0xff]  }
 0x1aa   : > { %4412 = vmatprep.subr.bf16.mxu1 %v4758_v28 }
 0x1ad   : > { %4413 = vmatpush3.bf16.msra.mxu1 %v4758_v28 }
 0x1ae   : > { %4414 = vmatprep.subr.bf16.mxu1 %v4759_v42 }
 0x1b0   : > { %4399 = vmatmul.mubr.bf16.gmra.mrb[8].mxu1 %v5414_v11  ;;  %v740_v11 = vadd.s32 152, %v5132_v37  ;;  %v4765_v37 = vld [vmem:[%s6139_s5 + $0x10] sm:$0xff]  }
 0x1b1   : > { %4415 = vmatpush3.bf16.msra.mxu1 %v4759_v42  ;;  %4402 = vmatprep.mubr.bf16.mxu1 %v5521_v31 }
 0x1b2   : > { %4416 = vmatprep.subr.bf16.mxu1 %v4760_v29  ;;  %v1056_v31 = vand.u32 15, %v740_v11 }
 0x1b4   : > { %vm1421_vm5 = vcmp.ne.s32.totalorder %v1056_v31, 15 }
 0x1b5   : > { %4417 = vmatpush3.bf16.msra.mxu1 %v4760_v29  ;;  %vm1524_vm7 = vmpackc.low %vm1421_vm5, %vm1421_vm5 }
 0x1b6   : > { %4418 = vmatprep.subr.bf16.mxu1 %v4761_v24  ;;  %v1544_v26 = vsel %vm1524_vm7, 65537, %v4884_v45  ;;  %v4768_v45 = vld [vmem:[%s6139_s5 + $0x28] sm:$0xff]  }
 0x1b7   : > { %v3710_v44 = vcombine.low %v5144_v46, %v1544_v26  ;;  %v4770_v46 = vld [vmem:[%s6139_s5 + $0x38] sm:$0xff]  }
 0x1b8   : > { %4403 = vmatmul.mubr.msk.bf16.gmra.mrb[12].mxu1 %vm3818_vm14, %v5512_v27  ;;  %v4764_v27 = vld [vmem:[%s6139_s5 + $0x8] sm:$0xff]  }
 0x1b9   : > { %4419 = vmatpush3.bf16.msra.mxu1 %v4761_v24  ;;  %4422 = vmatprep.mubr.msk.bf16.mxu1 %vm5695_vm2, %v5706_v53  ;;  %vm1463_vm2 = vmand %vm1462_vm10, %vm1422_vm12 }
 0x1ba   : > { %4420 = vmatprep.subr.bf16.mxu1 %v4762_v20  ;;  %4440 = vmatprep.subr.bf16.mxu0 %v4764_v27  ;;  %v1464_v53 = vsel %vm1463_vm2, %v5565_v19, 0 }
 0x1bb   : > { %4441 = vmatpush3.bf16.msra.mxu0 %v4764_v27 }
 0x1bc   : > { %4442 = vmatprep.subr.bf16.mxu0 %v4765_v37 }
 0x1bd   : > { %4421 = vmatpush3.bf16.msra.mxu1 %v4762_v20 }
 0x1bf   : > { %4443 = vmatpush3.bf16.msra.mxu0 %v4765_v37 }
 0x1c0   : > { %4423 = vmatmul.mubr.msk.bf16.vlgmr.msra.gmra.mrb[0].mxu1 %vm5740_vm15, %v5755_v57  ;;  %4444 = vmatprep.subr.bf16.mxu0 %v4766_v17  ;;  %vm1584_vm15 = vcmp.ne.s16.totalorder %v3710_v44, 0 }
 0x1c1   : > { %4426 = vmatprep.mubr.msk.bf16.mxu1 %vm6225_vm4, %v5762_v2 }
 0x1c3   : > { %4445 = vmatpush3.bf16.msra.mxu0 %v4766_v17 }
 0x1c4   : > { %4446 = vmatprep.subr.bf16.mxu0 %v4767_v21 }
 0x1c7   : > { %4447 = vmatpush3.bf16.msra.mxu0 %v4767_v21 }
 0x1c8   : > { %4427 = vmatmul.mubr.msk.bf16.gmra.mrb[4].mxu1 %vm5781_vm8, %v5800_v40  ;;  %4448 = vmatprep.subr.bf16.mxu0 %v4768_v45 }
 0x1c9   : > { %4430 = vmatprep.mubr.msk.bf16.mxu1 %vm5790_vm13, %v5806_v61 }
 0x1cb   : > { %4449 = vmatpush3.bf16.msra.mxu0 %v4768_v45 }
 0x1d0   : > { %4431 = vmatmul.mubr.msk.bf16.gmra.mrb[8].mxu1 %vm5820_vm0, %v5832_v1 }
 0x1d1   : > { %4434 = vmatprep.mubr.msk.bf16.mxu1 %vm5854_vm9, %v5572_v3  ;;  %v4769_v3 = vld [vmem:[%s6139_s5 + $0x30] sm:$0xff]  }
 0x1d2   : > { %4450 = vmatprep.subr.bf16.mxu0 %v4769_v3 }
 0x1d3   : > { %4451 = vmatpush3.bf16.msra.mxu0 %v4769_v3 }
 0x1d4   : > { %4452 = vmatprep.subr.bf16.mxu0 %v4770_v46 }
 0x1d7   : > { %4453 = vmatpush3.bf16.msra.mxu0 %v4770_v46 }
 0x1d8   : > { %4435 = vmatmul.mubr.msk.bf16.gmra.mrb[12].mxu1 %vm1584_vm15, %v1464_v53 }
 0x225   : > { %v4232_v19 = vpop.f32.mrb[20].mxu0 }
 0x226   : > { %v2015_v50 = vpop.f32.mrb[21].mxu0 }
 0x227   : > { %v4233_v43 = vpop.f32.mrb[22].mxu0 }
 0x228   : > { %v2018_v57 = vpop.f32.mrb[23].mxu0 }
 0x22d   : > { %v4236_v2 = vpop.f32.mrb[24].mxu0 }
 0x22e   : > { %v2031_v23 = vpop.f32.mrb[25].mxu0 }
 0x22f   : > { %v4237_v8 = vpop.f32.mrb[26].mxu0 }
 0x230   : > { %v2034_v25 = vpop.f32.mrb[27].mxu0 }
 0x235   : > { %v4240_v62 = vpop.f32.mrb[28].mxu0 }
 0x236   : > { %v2047_v13 = vpop.f32.mrb[29].mxu0 }
 0x237   : > { %v4241_v60 = vpop.f32.mrb[30].mxu0 }
 0x238   : > { %v2050_v5 = vpop.f32.mrb[31].mxu0 }
 0x23d   : > { %v4244_v35 = vpop.f32.mrb[32].mxu0 }
 0x23e   : > { %v5998_v15 = vpop.f32.mrb[33].mxu0 }
 0x23f   : > { %v6000_v12 = vpop.f32.mrb[34].mxu0 }
 0x240   : > { %v6002_v40 = vpop.f32.mrb[35].mxu0 }
 0x293   : > { %v4424_v61 = vpop.f32.mrb[0].mxu1 }
 0x294   : > { %v4470_v55 = vadd.f32 %v4424_v61, %v4232_v19  ;;  %v3077_v34 = vpop.f32.mrb[1].mxu1 }
 0x295   : > { %v4471_v58 = vadd.f32 %v3077_v34, %v2015_v50  ;;  %v4425_v56 = vpop.f32.mrb[2].mxu1 }
 0x296   : > { %v3163_v59 = vadd.f32 %v4470_v55, %v6007_v54  ;;  %v4472_v1 = vadd.f32 %v4425_v56, %v4233_v43  ;;  %v3080_v38 = vpop.f32.mrb[3].mxu1 }
 0x297   : > { %v3161_v7 = vadd.f32 %v4471_v58, %v6007_v54  ;;  %v4473_v9 = vadd.f32 %v3080_v38, %v2018_v57 }
 0x298   : > { %v3164_v14 = vadd.f32 %v4472_v1, %v6007_v54  ;;  %v3179_v52 = vmax.f32 %v3163_v59, 0.0 }
 0x299   : > { %v3162_v10 = vadd.f32 %v4473_v9, %v6007_v54  ;;  %v3177_v0 = vmax.f32 %v3161_v7, 0.0 }
 0x29a   : > { %v3180_v6 = vmax.f32 %v3164_v14, 0.0  ;;  %v4779_v14 = vld [vmem:[%s5053_s23 + $0x8] sm:$0xff]  }
 0x29b   : > { %v3178_v51 = vmax.f32 %v3162_v10, 0.0  ;;  %v4428_v18 = vpop.f32.mrb[4].mxu1  ;;  %v3219_v10 = vunpack.c.l.bf16 %v4779_v14 }
 0x29c   : > { %v3194_v63 = vpack.c.bf16 %v3180_v6, %v3179_v52  ;;  %v4474_v32 = vadd.f32 %v4428_v18, %v4236_v2  ;;  %v3093_v33 = vpop.f32.mrb[5].mxu1  ;;  %v4780_v6 = vld [vmem:[%s5053_s23] sm:$0xff]   ;;  %v3220_v18 = vunpack.c.h.bf16 %v4779_v14 }
 0x29d   : > { %v4475_v39 = vadd.f32 %v3093_v33, %v2031_v23  ;;  %v4429_v48 = vpop.f32.mrb[6].mxu1  ;;  %v3193_v36 = vpack.c.bf16 %v3178_v51, %v3177_v0  ;;  %v3218_v33 = vunpack.c.h.bf16 %v4780_v6 }
 0x29e   : > { %v3167_v22 = vadd.f32 %v4474_v32, %v6007_v54  ;;  %v4476_v47 = vadd.f32 %v4429_v48, %v4237_v8  ;;  %v3096_v16 = vpop.f32.mrb[7].mxu1 }
 0x29f   : > { %v3165_v30 = vadd.f32 %v4475_v39, %v6007_v54  ;;  %v4477_v41 = vadd.f32 %v3096_v16, %v2034_v25  ;;  %4454 = vmatprep.mubr.bf16.mxu0 %v3193_v36 }
 0x2a0   : > { %v3168_v49 = vadd.f32 %v4476_v47, %v6007_v54  ;;  %4455 = vmatmul.mubr.bf16.vlgmr.msra.gmra.mrb[36].mxu0 %v3194_v63  ;;  %v3183_v42 = vmax.f32 %v3167_v22, 0.0 }
 0x2a1   : > { %v3166_v28 = vadd.f32 %v4477_v41, %v6007_v54  ;;  %v3181_v24 = vmax.f32 %v3165_v30, 0.0 }
 0x2a2   : > { %v3184_v29 = vmax.f32 %v3168_v49, 0.0 }
 0x2a3   : > { %v3182_v20 = vmax.f32 %v3166_v28, 0.0  ;;  %v4432_v11 = vpop.f32.mrb[8].mxu1  ;;  %v4781_v28 = vld [vmem:[%s5053_s23 + $0x18] sm:$0xff]  }
 0x2a4   : > { %v4478_v4 = vadd.f32 %v4432_v11, %v4240_v62  ;;  %v3109_v27 = vpop.f32.mrb[9].mxu1  ;;  %v3196_v31 = vpack.c.bf16 %v3184_v29, %v3183_v42  ;;  %v3223_v42 = vunpack.c.l.bf16 %v4781_v28  ;;  %v4782_v11 = vld [vmem:[%s5053_s23 + $0x10] sm:$0xff]  }
 0x2a5   : > { %v4479_v37 = vadd.f32 %v3109_v27, %v2047_v13  ;;  %v4433_v17 = vpop.f32.mrb[10].mxu1  ;;  %v3195_v21 = vpack.c.bf16 %v3182_v20, %v3181_v24 }
 0x2a6   : > { %v3171_v26 = vadd.f32 %v4478_v4, %v6007_v54  ;;  %v4480_v44 = vadd.f32 %v4433_v17, %v4241_v60  ;;  %v3112_v53 = vpop.f32.mrb[11].mxu1  ;;  %v3221_v4 = vunpack.c.l.bf16 %v4782_v11  ;;  %v3224_v17 = vunpack.c.h.bf16 %v4781_v28 }
 0x2a7   : > { %v3169_v45 = vadd.f32 %v4479_v37, %v6007_v54  ;;  %v4481_v3 = vadd.f32 %v3112_v53, %v2050_v5  ;;  %4458 = vmatprep.mubr.bf16.mxu0 %v3195_v21  ;;  %v3222_v53 = vunpack.c.h.bf16 %v4782_v11 }
 0x2a8   : > { %v3172_v46 = vadd.f32 %v4480_v44, %v6007_v54  ;;  %4459 = vmatmul.mubr.bf16.gmra.mrb[40].mxu0 %v3196_v31  ;;  %v3187_v50 = vmax.f32 %v3171_v26, 0.0 }
 0x2a9   : > { %v3170_v19 = vadd.f32 %v4481_v3, %v6007_v54  ;;  %v3185_v57 = vmax.f32 %v3169_v45, 0.0 }
 0x2aa   : > { %v3188_v43 = vmax.f32 %v3172_v46, 0.0 }
 0x2ab   : > { %v3186_v2 = vmax.f32 %v3170_v19, 0.0  ;;  %v4436_v23 = vpop.f32.mrb[12].mxu1 }
 0x2ac   : > { %v4482_v8 = vadd.f32 %v4436_v23, %v4244_v35  ;;  %v3125_v25 = vpop.f32.mrb[13].mxu1  ;;  %v3198_v62 = vpack.c.bf16 %v3188_v43, %v3187_v50 }
 0x2ad   : > { %v4483_v13 = vadd.f32 %v3125_v25, %v5998_v15  ;;  %v4437_v60 = vpop.f32.mrb[14].mxu1  ;;  %v3197_v61 = vpack.c.bf16 %v3186_v2, %v3185_v57 }
 0x2ae   : > { %v3175_v5 = vadd.f32 %v4482_v8, %v6007_v54  ;;  %v4484_v55 = vadd.f32 %v4437_v60, %v6000_v12  ;;  %v3128_v34 = vpop.f32.mrb[15].mxu1  ;;  %v4783_v8 = vld [vmem:[%s5053_s23 + $0x28] sm:$0xff]  }
 0x2af   : > { %v3173_v58 = vadd.f32 %v4483_v13, %v6007_v54  ;;  %v4485_v56 = vadd.f32 %v3128_v34, %v6002_v40  ;;  %4462 = vmatprep.mubr.bf16.mxu0 %v3197_v61  ;;  %v6031_v40 = vld [vmem:[%s6140_s6 + $0x2] ss:$0 sm:$0xff]  ;;  %v3227_v25 = vunpack.c.l.bf16 %v4783_v8 }
 0x2b0   : > { %v3176_v35 = vadd.f32 %v4484_v55, %v6007_v54  ;;  %4463 = vmatmul.mubr.bf16.gmra.mrb[44].mxu0 %v3198_v62  ;;  %v3191_v15 = vmax.f32 %v3175_v5, 0.0  ;;  %v4784_v61 = vld [vmem:[%s5053_s23 + $0x20] sm:$0xff]  }
 0x2b1   : > { %v3174_v59 = vadd.f32 %v4485_v56, %v6007_v54  ;;  %v3189_v38 = vmax.f32 %v3173_v58, 0.0  ;;  %v3217_v54 = vunpack.c.l.bf16 %v4780_v6  ;;  %v3225_v5 = vunpack.c.l.bf16 %v4784_v61 }
 0x2b2   : > { %v3192_v1 = vmax.f32 %v3176_v35, 0.0  ;;  %v3228_v56 = vunpack.c.h.bf16 %v4783_v8 }
 0x2b3   : > { %v3190_v7 = vmax.f32 %v3174_v59, 0.0 }
 0x2b4   : > { %v3200_v9 = vpack.c.bf16 %v3192_v1, %v3191_v15  ;;  %v3226_v1 = vunpack.c.h.bf16 %v4784_v61 }
 0x2b5   : > { %v3199_v12 = vpack.c.bf16 %v3190_v7, %v3189_v38 }
 0x2b7   : > { %4466 = vmatprep.mubr.bf16.mxu0 %v3199_v12 }
 0x2b8   : > { %4467 = vmatmul.mubr.bf16.gmra.mrb[48].mxu0 %v3200_v9 }
 0x373   : > { %v4456_v52 = vpop.f32.mrb[36].mxu0 }
 0x374   : > { %v3329_v0 = vadd.f32 %v4456_v52, %v6031_v40  ;;  %v3320_v51 = vpop.f32.mrb[37].mxu0 }
 0x375   : > { %v3321_v63 = vadd.f32 %v6031_v40, %v3320_v51  ;;  %v4457_v32 = vpop.f32.mrb[38].mxu0 }
 0x376   : > { %v3385_v39 = vadd.f32 %v3329_v0, %v3219_v10  ;;  %v3332_v48 = vadd.f32 %v4457_v32, %v6031_v40  ;;  %v3323_v36 = vpop.f32.mrb[39].mxu0  ;;  %v4785_v0 = vld [vmem:[%s5053_s23 + $0x38] sm:$0xff]  }
 0x377   : > { %v3383_v22 = vadd.f32 %v3321_v63, %v3217_v54  ;;  %v3324_v47 = vadd.f32 %v6031_v40, %v3323_v36  ;;  %v3231_v51 = vunpack.c.l.bf16 %v4785_v0 }
 0x378   : > { %v3386_v16 = vadd.f32 %v3332_v48, %v3220_v18  ;;  %v3401_v41 = vmax.f32 %v3385_v39, 0.0 }
 0x379   : > { %v3384_v30 = vadd.f32 %v3324_v47, %v3218_v33  ;;  %v3399_v29 = vmax.f32 %v3383_v22, 0.0  ;;  %v4786_v33 = vld [vmem:[%s5053_s23 + $0x30] sm:$0xff]   ;;  %v3232_v47 = vunpack.c.h.bf16 %v4785_v0  ;;  %s3509_s23 = sadd.s32 %s3888_s9, %s3866_s21 }
 0x37a   : > { %v3402_v49 = vmax.f32 %v3386_v16, 0.0  ;;  %v3229_v39 = vunpack.c.l.bf16 %v4786_v33  ;;  %s3867_s27 = sshll.u32 %s3509_s23, 6 }
 0x37b   : > { %v3400_v24 = vmax.f32 %v3384_v30, 0.0  ;;  %v4460_v20 = vpop.f32.mrb[40].mxu0  ;;  %s6074_s12 = scalar_lea.hbm %s6141_s7, %s3867_s27 }
 0x37c   : > { %v3897_v27 = vpack.c.bf16 %v3402_v49, %v3401_v41  ;;  %v3345_v31 = vadd.f32 %v4460_v20, %v6031_v40  ;;  %v3336_v37 = vpop.f32.mrb[41].mxu0  ;;  %v3230_v49 = vunpack.c.h.bf16 %v4786_v33 }
 0x37d   : > { %v3892_v21 = vpack.c.bf16 %v3400_v24, %v3399_v29  ;;  %v3337_v26 = vadd.f32 %v6031_v40, %v3336_v37  ;;  %v4461_v44 = vpop.f32.mrb[42].mxu0 }
 0x37e   : > { %3929 = vst [vmem:[%s6046_s20 + $0x8] sm:$0xff] %v3897_v27   ;;  %v3389_v45 = vadd.f32 %v3345_v31, %v3223_v42  ;;  %v3348_v3 = vadd.f32 %v4461_v44, %v6031_v40  ;;  %v3339_v46 = vpop.f32.mrb[43].mxu0 }
 0x37f   : > { %3893 = vst [vmem:[%s6046_s20] sm:$0xff] %v3892_v21   ;;  %v3387_v19 = vadd.f32 %v3337_v26, %v3221_v4  ;;  %v3340_v50 = vadd.f32 %v6031_v40, %v3339_v46 }
 0x380   : > { %v3390_v43 = vadd.f32 %v3348_v3, %v3224_v17  ;;  %v3405_v2 = vmax.f32 %v3389_v45, 0.0 }
 0x381   : > { %v3388_v57 = vadd.f32 %v3340_v50, %v3222_v53  ;;  %v3403_v62 = vmax.f32 %v3387_v19, 0.0 }
 0x382   : > { %v3406_v23 = vmax.f32 %v3390_v43, 0.0 }
 0x383   : > { %v3404_v13 = vmax.f32 %v3388_v57, 0.0  ;;  %v4464_v60 = vpop.f32.mrb[44].mxu0 }
 0x384   : > { %v3907_v55 = vpack.c.bf16 %v3406_v23, %v3405_v2  ;;  %v3361_v34 = vadd.f32 %v4464_v60, %v6031_v40  ;;  %v3352_v58 = vpop.f32.mrb[45].mxu0 }
 0x385   : > { %v3902_v35 = vpack.c.bf16 %v3404_v13, %v3403_v62  ;;  %v3353_v59 = vadd.f32 %v6031_v40, %v3352_v58  ;;  %v4465_v15 = vpop.f32.mrb[46].mxu0 }
 0x386   : > { %3931 = vst [vmem:[%s6046_s20 + $0x18] sm:$0xff] %v3907_v55   ;;  %v3393_v38 = vadd.f32 %v3361_v34, %v3227_v25  ;;  %v3364_v7 = vadd.f32 %v4465_v15, %v6031_v40  ;;  %v3355_v9 = vpop.f32.mrb[47].mxu0 }
 0x387   : > { %3930 = vst [vmem:[%s6046_s20 + $0x10] sm:$0xff] %v3902_v35   ;;  %v3391_v12 = vadd.f32 %v3353_v59, %v3225_v5  ;;  %v3356_v14 = vadd.f32 %v6031_v40, %v3355_v9 }
 0x388   : > { %v3394_v10 = vadd.f32 %v3364_v7, %v3228_v56  ;;  %v3409_v6 = vmax.f32 %v3393_v38, 0.0 }
 0x389   : > { %v3392_v52 = vadd.f32 %v3356_v14, %v3226_v1  ;;  %v3407_v18 = vmax.f32 %v3391_v12, 0.0 }
 0x38a   : > { %v3410_v54 = vmax.f32 %v3394_v10, 0.0 }
 0x38b   : > { %v3408_v63 = vmax.f32 %v3392_v52, 0.0  ;;  %v4468_v32 = vpop.f32.mrb[48].mxu0 }
 0x38c   : > { %v3917_v48 = vpack.c.bf16 %v3410_v54, %v3409_v6  ;;  %v3377_v36 = vadd.f32 %v4468_v32, %v6031_v40  ;;  %v3368_v22 = vpop.f32.mrb[49].mxu0 }
 0x38d   : > { %v3912_v16 = vpack.c.bf16 %v3408_v63, %v3407_v18  ;;  %v3369_v30 = vadd.f32 %v6031_v40, %v3368_v22  ;;  %v4469_v41 = vpop.f32.mrb[50].mxu0 }
 0x38e   : > { %3933 = vst [vmem:[%s6046_s20 + $0x28] sm:$0xff] %v3917_v48   ;;  %v3397_v28 = vadd.f32 %v3377_v36, %v3231_v51  ;;  %v3380_v42 = vadd.f32 %v4469_v41, %v6031_v40  ;;  %v3371_v29 = vpop.f32.mrb[51].mxu0 }
 0x38f   : > { %3932 = vst [vmem:[%s6046_s20 + $0x20] sm:$0xff] %v3912_v16   ;;  %v3395_v24 = vadd.f32 %v3369_v30, %v3229_v39  ;;  %v3372_v20 = vadd.f32 %v6031_v40, %v3371_v29 }
 0x390   : > { %v3398_v11 = vadd.f32 %v3380_v42, %v3232_v47  ;;  %v3413_v27 = vmax.f32 %v3397_v28, 0.0 }
 0x391   : > { %v3396_v4 = vadd.f32 %v3372_v20, %v3230_v49  ;;  %v3411_v37 = vmax.f32 %v3395_v24, 0.0 }
 0x392   : > { %v3414_v31 = vmax.f32 %v3398_v11, 0.0 }
 0x393   : > { %v3412_v17 = vmax.f32 %v3396_v4, 0.0 }
 0x394   : > { %v3927_v21 = vpack.c.bf16 %v3414_v31, %v3413_v27 }
 0x395   : > { %v3922_v40 = vpack.c.bf16 %v3412_v17, %v3411_v37 }
 0x396   : > { %3935 = vst [vmem:[%s6046_s20 + $0x38] sm:$0xff] %v3927_v21  }
 0x397   : > { %3934 = vst [vmem:[%s6046_s20 + $0x30] sm:$0xff] %v3922_v40  }
 0x398   : > { %4800 = shalt.err (!%p4797_p13)
}
 0x399   : > { %s4801_s29 = scalar_lea.hbm %s6074_s12, 1024  ;;  %s4805_s20 = scalar_lea.hbm %s6141_s7, 4096 }
 0x39a   : > { %p4802_p0 = scmp.ne.s32.totalorder %s6074_s12, %s4801_s29  ;;  %p4806_p4 = scmp.lt.u32.totalorder %s6074_s12, %s6141_s7 }
 0x39b   : > { %p4807_p5 = scmp.lt.u32.totalorder %s4805_s20, %s4801_s29  ;;  %p4809_p7 = scmp.lt.u32.totalorder %s4801_s29, %s6074_s12 }
 0x39c   : > { %p4803_p1 = pnand %p4802_p0, %p4979_p3 }
 0x39d   : > { %p4808_p6 = por %p4807_p5, %p4806_p4 }
 0x39e   : > { %p4804_p2 = pneg %p4803_p1 }
 0x39f   : > { %p4810_p9 = por %p4809_p7, %p4808_p6 }
 0x3a1   : > { %p4811_p10 = pnand %p4810_p9, %p4804_p2 }
 0x3a3   : > { %4814 = shalt.err (!%p4811_p10)
}
 0x3a4   : > { %s4886_s23 = smov 64   ;;  %s4887_s27 = smov 4  }
 0x3a5   : > { %4598 = dma.vmem_to_hbm [thread:$0]  (%p4979_p3), %s6076_s28, 1024, %s6074_s12, %s6082_s13, %s4886_s23, %s4886_s23, %s4887_s27  }
 0x3a6 PF: > { %p4604_p11 = scmp.ge.s32.totalorder %s4881_s8, 2  ;;  %s3527_s22 = sand.u32 1, %s4853_s24  }
 0x3a7   : > { %s3528_s17 = scalar_lea.sflag [#allocation3], %s3527_s22 }
 0x3a8   : > { %p4601_p12 = pnand %p4604_p11, %p4988_p8 }
 0x3aa   : > { %4848 = dma.done.wait (!%p4601_p12), %s3528_s17, 1024  }
 0x3ab   : > { %4850 = vsyncadd (!%p4601_p12), %s3528_s17, 4294966272  ;;  %s20_s8 = sadd.s32 1, %s4881_s8   ;;  %s6226_s30 = sld [smem:[#allocation9_spill]] }
 0x3ac   : > { %p17_p13 = scmp.ge.s32.totalorder %s20_s8, 6   ;;  %s6227_s27 = sld [smem:[#allocation5_spill]] }
 0x3ad   : > { %s6228_s28 = sld [smem:[#allocation6_spill]]  ;;  %s6229_s29 = sld [smem:[#allocation7_spill]] }
 0x3ae   : > { %s6230_s14 = sld [smem:[#allocation8_spill]]  ;;  %s6231_s24 = smov %s4857_s25 }
 0x3af   : > { %s6232_s25 = smov %s4861_s26  ;;  %19 = sbr.rel (!%p17_p13) target bundleno = 5 (0x5), region = 89 }
 0x3b1   : > { %s6233_s26 = smov %s6226_s30 }
 0x3b4   : > { %s6234_s30 = smov %s6230_s14 }
 0x3b6   :  { %3533 = vsyncpa [#allocation3], 1 }
 0x3b7   :  { %3535 = vsyncpa [#allocation3 + $0x1], 1 }

</bundles_post_ra>
